<compile_context>
chip_gen: v7x
topology: tpu7x:2x2x1
jax: 0.10.0
libtpu: 0.0.40
codegen_flags: <defaults>
</compile_context>

<pallas_src>
import functools

import numpy as np

import jax
import jax.numpy as jnp
from jax import lax
from jax.experimental import pallas as pl
from jax.experimental.pallas import tpu as pltpu


# ----------------------------- model hyper-params -----------------------------
BATCH = 2
IN_CH = 4           # params.input_channels
OUT_CH = 4          # params.output_channels
KSIZE = 3           # params.kernel_size
STRIDE = 1          # params.stride
KSIZE_MP = 2        # params.kernel_size_mp
STRIDE_MP = 2       # params.stride_mp
PADDING = 1         # params.padding
IMAGE_DIM = 16      # params.image_dim (small for this synthetic test)

_HIGHEST = jax.lax.Precision.HIGHEST


# --------------------------------- fused kernel --------------------------------
def _fused_kernel(x_ref, L1_ref, b1_ref, L2_ref, b2_ref,
                  sh1_ref, sw1_ref, sh2_ref, sw2_ref, o_ref,
                  *, B, KW, pad, Wp1, Wo1, RP1, W2, Wo2, RP2, Wf):
    """Whole-batch fused forward: conv1+ReLU+pool1+conv2+ReLU+pool2 (+free flatten).

    Activations live in a (C*H, B*W) layout: rows are (channel, height) and columns are
    (batch, width), so the batch rides the MXU N / lane dimension.

    x_ref  : (Cin*H, B*Wp1)        width-padded, batch-merged input
    L1_ref : (Cout*Ho1, KW*Cin*H)  conv1 as a single banded matmul LHS
    b1_ref : (Cout*Ho1, 1)         conv1 bias, repeated over rows
    L2_ref : (Cout*Ho2, KW*Cout*H2)
    b2_ref : (Cout*Ho2, 1)
    sh*_ref, sw*_ref : stacked even/odd 0/1 pooling selection matrices
    o_ref  : (B, Cout*Hf, Wf)      row-major per batch == NCHW flatten order
    """
    f32 = jnp.float32

    # ---- conv1: stack the KW shifted width windows (all batches) and do ONE MXU dot ----
    row_blocks = []
    for dw in range(KW):
        cols = [x_ref[:, b * Wp1 + dw: b * Wp1 + dw + Wo1] for b in range(B)]
        row_blocks.append(jnp.concatenate(cols, axis=1) if B > 1 else cols[0])
    rhs1 = jnp.concatenate(row_blocks, axis=0) if KW > 1 else row_blocks[0]

    y1 = jnp.dot(L1_ref[...], rhs1, preferred_element_type=f32)   # DEFAULT precision (perf)
    y1 = jnp.maximum(y1 + b1_ref[...], 0.0)                       # (Cout*Ho1, B*Wo1)

    # ---- maxpool1: stacked even/odd selection dots (exact) + max of halves ----
    r1 = jnp.dot(sh1_ref[...], y1, preferred_element_type=f32, precision=_HIGHEST)
    mh1 = jnp.maximum(r1[:RP1], r1[RP1:])                         # (Cout*H2, B*Wo1)
    c1 = jnp.dot(mh1, sw1_ref[...], preferred_element_type=f32, precision=_HIGHEST)
    p1 = jnp.maximum(c1[:, :B * W2], c1[:, B * W2:])              # (Cout*H2, B*W2)

    # ---- conv2: build zero-boundary width windows from p1 as values (no pad scratch) ----
    row_blocks2 = []
    for dw in range(KW):
        s = dw - pad
        cols = []
        for b in range(B):
            lo, hi = max(0, -s), min(Wo2, W2 - s)
            pieces = []
            if lo > 0:
                pieces.append(jnp.zeros((RP1, lo), f32))
            pieces.append(p1[:, b * W2 + lo + s: b * W2 + hi + s])
            if hi < Wo2:
                pieces.append(jnp.zeros((RP1, Wo2 - hi), f32))
            cols.append(jnp.concatenate(pieces, axis=1) if len(pieces) > 1 else pieces[0])
        row_blocks2.append(jnp.concatenate(cols, axis=1) if B > 1 else cols[0])
    rhs2 = jnp.concatenate(row_blocks2, axis=0) if KW > 1 else row_blocks2[0]

    y2 = jnp.dot(L2_ref[...], rhs2, preferred_element_type=f32)   # one MXU dot
    y2 = jnp.maximum(y2 + b2_ref[...], 0.0)                       # (Cout*Ho2, B*Wo2)

    # ---- maxpool2 ----
    r2 = jnp.dot(sh2_ref[...], y2, preferred_element_type=f32, precision=_HIGHEST)
    mh2 = jnp.maximum(r2[:RP2], r2[RP2:])                         # (Cout*Hf, B*Wo2)
    c2 = jnp.dot(mh2, sw2_ref[...], preferred_element_type=f32, precision=_HIGHEST)
    p2 = jnp.maximum(c2[:, :B * Wf], c2[:, B * Wf:])              # (Cout*Hf, B*Wf)

    # ---- split the lane-merged batch back out; row-major == NCHW flatten order ----
    for b in range(B):
        o_ref[b] = p2[:, b * Wf:(b + 1) * Wf].astype(o_ref.dtype)


# ------------------------------- wrapper / glue --------------------------------
def _conv_as_matmul_lhs(w_oihw, h_in, pad):
    """Fold an OIHW conv weight into a single matmul LHS of shape (Cout*Ho, KW*Cin*h_in).

    Column block dw holds the height-banded matrix for width tap dw, built against the
    UNPADDED row space (padded rows only ever multiply zeros, so their columns are omitted):
        L[co*Ho + h, dw*Cin*h_in + ci*h_in + (h + dh - pad)] = w[co, ci, dh, dw].
    Tiny parameter preprocessing, done once per call outside the kernel.
    """
    Cout, Cin, KH, KW = w_oihw.shape
    Ho = h_in + 2 * pad - KH + 1
    w = w_oihw.astype(jnp.float32)
    blocks = []
    for dw in range(KW):
        Ldw = jnp.zeros((Cout * Ho, Cin * h_in), jnp.float32)
        for dh in range(KH):
            Ldw = Ldw + jnp.kron(w[:, :, dh, dw],
                                 jnp.eye(Ho, h_in, k=dh - pad, dtype=jnp.float32))
        blocks.append(Ldw)
    return jnp.concatenate(blocks, axis=1)            # (Cout*Ho, KW*Cin*h_in)


def _pool_row_mask(C, Hin):
    """Stacked even/odd row-pool selection: (2*C*Hout, C*Hin), Hout = Hin // 2."""
    Hout = Hin // 2
    m = np.zeros((2 * C * Hout, C * Hin), np.float32)
    for k in range(2):
        for c in range(C):
            for hh in range(Hout):
                m[k * C * Hout + c * Hout + hh, c * Hin + 2 * hh + k] = 1.0
    return m


def _pool_col_mask(B, Win):
    """Stacked even/odd column-pool selection (per batch block): (B*Win, 2*B*Wout)."""
    Wout = Win // 2
    m = np.zeros((B * Win, 2 * B * Wout), np.float32)
    for k in range(2):
        for b in range(B):
            for ww in range(Wout):
                m[b * Win + 2 * ww + k, k * B * Wout + b * Wout + ww] = 1.0
    return m


@jax.jit
def conv2d_block_toFC_pallas(x_nchw, w1, b1, w2, b2):
    """Full forward of Conv2d_block_toFC. x_nchw: (B, Cin, H, W) -> (B, Cout*Hf*Wf)."""
    B, Cin, H, W = x_nchw.shape
    Cout, _, KH, KW = w1.shape
    pad = PADDING

    assert STRIDE == 1, "TODO(synk): stride > 1 not implemented"
    assert KSIZE_MP == 2 and STRIDE_MP == 2, "TODO(synk): only 2x2/stride-2 max-pool implemented"

    Ho1 = H + 2 * pad - KH + 1
    Wo1 = W + 2 * pad - KW + 1
    assert Ho1 % 2 == 0 and Wo1 % 2 == 0, "max-pool would silently truncate"
    H2, W2 = Ho1 // 2, Wo1 // 2
    Ho2 = H2 + 2 * pad - KH + 1
    Wo2 = W2 + 2 * pad - KW + 1
    assert Ho2 % 2 == 0 and Wo2 % 2 == 0, "max-pool would silently truncate"
    Hf, Wf = Ho2 // 2, Wo2 // 2
    Wp1 = W + 2 * pad

    # Parameter preprocessing (tiny, once per call, outside the kernel).
    L1 = _conv_as_matmul_lhs(w1, H, pad)                        # (Cout*Ho1, KW*Cin*H)
    L2 = _conv_as_matmul_lhs(w2, H2, pad)                       # (Cout*Ho2, KW*Cout*H2)
    b1c = jnp.repeat(b1.astype(jnp.float32), Ho1)[:, None]      # (Cout*Ho1, 1)
    b2c = jnp.repeat(b2.astype(jnp.float32), Ho2)[:, None]      # (Cout*Ho2, 1)

    # Precomputed 0/1 pooling selection masks (trace-time constants).
    SH1 = jnp.asarray(_pool_row_mask(Cout, Ho1))                # (2*Cout*H2, Cout*Ho1)
    SW1 = jnp.asarray(_pool_col_mask(B, Wo1))                   # (B*Wo1, 2*B*W2)
    SH2 = jnp.asarray(_pool_row_mask(Cout, Ho2))                # (2*Cout*Hf, Cout*Ho2)
    SW2 = jnp.asarray(_pool_col_mask(B, Wo2))                   # (B*Wo2, 2*B*Wf)

    # NCHW -> (Cin*H, B, W) -> width pad -> (Cin*H, B*Wp1): batch merged along lanes.
    x_t = jnp.transpose(x_nchw.astype(jnp.float32), (1, 2, 0, 3)).reshape(Cin * H, B, W)
    x1 = jnp.pad(x_t, ((0, 0), (0, 0), (pad, pad))).reshape(Cin * H, B * Wp1)

    kernel = functools.partial(
        _fused_kernel, B=B, KW=KW, pad=pad, Wp1=Wp1, Wo1=Wo1,
        RP1=Cout * H2, W2=W2, Wo2=Wo2, RP2=Cout * Hf, Wf=Wf)

    out3 = pl.pallas_call(
        kernel,
        out_shape=jax.ShapeDtypeStruct((B, Cout * Hf, Wf), jnp.float32),
        grid_spec=pltpu.PrefetchScalarGridSpec(
            num_scalar_prefetch=0,
            grid=(1,),                                   # whole batch in one step
            in_specs=[
                pl.BlockSpec(x1.shape, lambda i: (0, 0)),
                pl.BlockSpec(L1.shape, lambda i: (0, 0)),
                pl.BlockSpec(b1c.shape, lambda i: (0, 0)),
                pl.BlockSpec(L2.shape, lambda i: (0, 0)),
                pl.BlockSpec(b2c.shape, lambda i: (0, 0)),
                pl.BlockSpec(SH1.shape, lambda i: (0, 0)),
                pl.BlockSpec(SW1.shape, lambda i: (0, 0)),
                pl.BlockSpec(SH2.shape, lambda i: (0, 0)),
                pl.BlockSpec(SW2.shape, lambda i: (0, 0)),
            ],
            out_specs=pl.BlockSpec((B, Cout * Hf, Wf), lambda i: (0, 0, 0)),
        ),
        compiler_params=pltpu.CompilerParams(dimension_semantics=("arbitrary",)),
    )(x1, L1, b1c, L2, b2c, SH1, SW1, SH2, SW2)

    # (B, Cout*Hf, Wf) -> (B, Cout*Hf*Wf): free reshape, already in NCHW flatten order.
    return out3.reshape(B, Cout * Hf * Wf)


# ------------------------------ pure-JAX reference ------------------------------
def conv2d_block_toFC_ref(x_nchw, w1, b1, w2, b2):
    def conv_relu(x, w_oihw, b):
        y = lax.conv_general_dilated(
            x, w_oihw, window_strides=(STRIDE, STRIDE),
            padding=((PADDING, PADDING), (PADDING, PADDING)),
            dimension_numbers=("NCHW", "OIHW", "NCHW"),
            precision=lax.Precision.HIGHEST)
        return jnp.maximum(y + b.reshape(1, -1, 1, 1), 0.0)

    def pool(x):
        return lax.reduce_window(x, -jnp.inf, lax.max,
                                 (1, 1, KSIZE_MP, KSIZE_MP),
                                 (1, 1, STRIDE_MP, STRIDE_MP), "VALID")

    y = pool(conv_relu(x_nchw, w1, b1))
    y = pool(conv_relu(y, w2, b2))
    return y.reshape(y.shape[0], -1)


# ------------------------------------ main ------------------------------------
if __name__ == "__main__":
    key = jax.random.PRNGKey(0)
    kx, kw1, kb1, kw2, kb2 = jax.random.split(key, 5)

    x = jax.random.normal(kx, (BATCH, IN_CH, IMAGE_DIM, IMAGE_DIM), jnp.float32)
    # Parameters in PyTorch Conv2d (OIHW) layout.
    w1 = 0.1 * jax.random.normal(kw1, (OUT_CH, IN_CH, KSIZE, KSIZE), jnp.float32)
    b1 = 0.1 * jax.random.normal(kb1, (OUT_CH,), jnp.float32)
    w2 = 0.1 * jax.random.normal(kw2, (OUT_CH, OUT_CH, KSIZE, KSIZE), jnp.float32)
    b2 = 0.1 * jax.random.normal(kb2, (OUT_CH,), jnp.float32)

    out = conv2d_block_toFC_pallas(x, w1, b1, w2, b2)
    out = jax.block_until_ready(out)

    ref = conv2d_block_toFC_ref(x, w1, b1, w2, b2)
    expected_feat = OUT_CH * (IMAGE_DIM // (STRIDE_MP * STRIDE_MP)) ** 2
    assert out.shape == (BATCH, expected_feat), out.shape
    max_err = float(jnp.max(jnp.abs(out - ref)))
    # Conv dots run at DEFAULT MXU precision (per perf review): bf16 rounding of O(1)
    # activations/weights can give up to ~1e-2 abs deviation vs. the f32/HIGHEST reference.
    # Pooling and biases are exact. Tolerance widened accordingly.
    assert max_err < 2e-2, f"mismatch vs reference: {max_err}"

    print("KERNEL_OK")
</pallas_src>

<mosaic_0001>
module attributes {stable_mosaic.version = 11 : i64} {
  func.func @_fused_kernel(%arg0: i32, %arg1: memref<64x36xf32, #tpu.memory_space<vmem>>, %arg2: memref<64x192xf32, #tpu.memory_space<vmem>>, %arg3: memref<64x1xf32, #tpu.memory_space<vmem>>, %arg4: memref<32x96xf32, #tpu.memory_space<vmem>>, %arg5: memref<32x1xf32, #tpu.memory_space<vmem>>, %arg6: memref<64x64xf32, #tpu.memory_space<vmem>>, %arg7: memref<32x32xf32, #tpu.memory_space<vmem>>, %arg8: memref<32x32xf32, #tpu.memory_space<vmem>>, %arg9: memref<16x16xf32, #tpu.memory_space<vmem>>, %arg10: memref<2x16x4xf32, #tpu.memory_space<vmem>>) attributes {dimension_semantics = [#tpu.dimension_semantics<arbitrary>], iteration_bounds = array<i64: 1>, scalar_prefetch = 0 : i64, scratch_operands = 0 : i64, tpu.core_type = #tpu.core_type<tc>, window_params = [{pipeline_mode = #tpu.pipeline_mode<synchronous>, transform_indices = @transform_0, window_bounds = array<i64: 64, 36>}, {pipeline_mode = #tpu.pipeline_mode<synchronous>, transform_indices = @transform_1, window_bounds = array<i64: 64, 192>}, {pipeline_mode = #tpu.pipeline_mode<synchronous>, transform_indices = @transform_2, window_bounds = array<i64: 64, 1>}, {pipeline_mode = #tpu.pipeline_mode<synchronous>, transform_indices = @transform_3, window_bounds = array<i64: 32, 96>}, {pipeline_mode = #tpu.pipeline_mode<synchronous>, transform_indices = @transform_4, window_bounds = array<i64: 32, 1>}, {pipeline_mode = #tpu.pipeline_mode<synchronous>, transform_indices = @transform_5, window_bounds = array<i64: 64, 64>}, {pipeline_mode = #tpu.pipeline_mode<synchronous>, transform_indices = @transform_6, window_bounds = array<i64: 32, 32>}, {pipeline_mode = #tpu.pipeline_mode<synchronous>, transform_indices = @transform_7, window_bounds = array<i64: 32, 32>}, {pipeline_mode = #tpu.pipeline_mode<synchronous>, transform_indices = @transform_8, window_bounds = array<i64: 16, 16>}, {pipeline_mode = #tpu.pipeline_mode<synchronous>, transform_indices = @transform_9, window_bounds = array<i64: 2, 16, 4>}]} {
    %c0 = arith.constant 0 : index
    %c0_0 = arith.constant 0 : index
    %0 = vector.load %arg1[%c0, %c0_0] : memref<64x36xf32, #tpu.memory_space<vmem>>, vector<64x16xf32>
    %c0_1 = arith.constant 0 : index
    %c18 = arith.constant 18 : index
    %1 = vector.load %arg1[%c0_1, %c18] : memref<64x36xf32, #tpu.memory_space<vmem>>, vector<64x16xf32>
    %2 = tpu.concatenate %0, %1 in 1 : vector<64x16xf32>, vector<64x16xf32> -> vector<64x32xf32>
    %c0_2 = arith.constant 0 : index
    %c1 = arith.constant 1 : index
    %3 = vector.load %arg1[%c0_2, %c1] : memref<64x36xf32, #tpu.memory_space<vmem>>, vector<64x16xf32>
    %c0_3 = arith.constant 0 : index
    %c19 = arith.constant 19 : index
    %4 = vector.load %arg1[%c0_3, %c19] : memref<64x36xf32, #tpu.memory_space<vmem>>, vector<64x16xf32>
    %5 = tpu.concatenate %3, %4 in 1 : vector<64x16xf32>, vector<64x16xf32> -> vector<64x32xf32>
    %c0_4 = arith.constant 0 : index
    %c2 = arith.constant 2 : index
    %6 = vector.load %arg1[%c0_4, %c2] : memref<64x36xf32, #tpu.memory_space<vmem>>, vector<64x16xf32>
    %c0_5 = arith.constant 0 : index
    %c20 = arith.constant 20 : index
    %7 = vector.load %arg1[%c0_5, %c20] : memref<64x36xf32, #tpu.memory_space<vmem>>, vector<64x16xf32>
    %8 = tpu.concatenate %6, %7 in 1 : vector<64x16xf32>, vector<64x16xf32> -> vector<64x32xf32>
    %9 = tpu.concatenate %2, %5, %8 in 0 : vector<64x32xf32>, vector<64x32xf32>, vector<64x32xf32> -> vector<192x32xf32>
    %c0_6 = arith.constant 0 : index
    %c0_7 = arith.constant 0 : index
    %10 = vector.load %arg2[%c0_6, %c0_7] : memref<64x192xf32, #tpu.memory_space<vmem>>, vector<64x192xf32>
    %cst = arith.constant dense<0.000000e+00> : vector<64x32xf32>
    %11 = tpu.matmul %10, %9, %cst {dimension_numbers = #tpu.dot_dimension_numbers<[1], [0], [0], [1], [0, 0, 1, 1], [], []>} : vector<64x192xf32>, vector<192x32xf32>, vector<64x32xf32> -> vector<64x32xf32>
    %c0_8 = arith.constant 0 : index
    %c0_9 = arith.constant 0 : index
    %12 = vector.load %arg3[%c0_8, %c0_9] : memref<64x1xf32, #tpu.memory_space<vmem>>, vector<64x1xf32>
    %13 = vector.broadcast %12 : vector<64x1xf32> to vector<64x32xf32>
    %14 = arith.addf %11, %13 : vector<64x32xf32>
    %cst_10 = arith.constant 0.000000e+00 : f32
    %15 = vector.broadcast %cst_10 : f32 to vector<64x32xf32>
    %16 = arith.maximumf %14, %15 : vector<64x32xf32>
    %c0_11 = arith.constant 0 : index
    %c0_12 = arith.constant 0 : index
    %17 = vector.load %arg6[%c0_11, %c0_12] : memref<64x64xf32, #tpu.memory_space<vmem>>, vector<64x64xf32>
    %cst_13 = arith.constant dense<0.000000e+00> : vector<64x32xf32>
    %18 = tpu.matmul %17, %16, %cst_13 {dimension_numbers = #tpu.dot_dimension_numbers<[1], [0], [0], [1], [0, 0, 1, 1], [], []>, precision = #tpu.contract_precision<fp32>} : vector<64x64xf32>, vector<64x32xf32>, vector<64x32xf32> -> vector<64x32xf32>
    %19 = vector.extract_strided_slice %18 {offsets = [0, 0], sizes = [32, 32], strides = [1, 1]} : vector<64x32xf32> to vector<32x32xf32>
    %20 = vector.extract_strided_slice %18 {offsets = [32, 0], sizes = [32, 32], strides = [1, 1]} : vector<64x32xf32> to vector<32x32xf32>
    %21 = arith.maximumf %19, %20 : vector<32x32xf32>
    %c0_14 = arith.constant 0 : index
    %c0_15 = arith.constant 0 : index
    %22 = vector.load %arg7[%c0_14, %c0_15] : memref<32x32xf32, #tpu.memory_space<vmem>>, vector<32x32xf32>
    %cst_16 = arith.constant dense<0.000000e+00> : vector<32x32xf32>
    %23 = tpu.matmul %21, %22, %cst_16 {dimension_numbers = #tpu.dot_dimension_numbers<[1], [0], [0], [1], [0, 0, 1, 1], [], []>, precision = #tpu.contract_precision<fp32>} : vector<32x32xf32>, vector<32x32xf32>, vector<32x32xf32> -> vector<32x32xf32>
    %24 = vector.extract_strided_slice %23 {offsets = [0, 0], sizes = [32, 16], strides = [1, 1]} : vector<32x32xf32> to vector<32x16xf32>
    %25 = vector.extract_strided_slice %23 {offsets = [0, 16], sizes = [32, 16], strides = [1, 1]} : vector<32x32xf32> to vector<32x16xf32>
    %26 = arith.maximumf %24, %25 : vector<32x16xf32>
    %cst_17 = arith.constant 0.000000e+00 : f32
    %27 = vector.broadcast %cst_17 : f32 to vector<32x1xf32>
    %28 = vector.extract_strided_slice %26 {offsets = [0, 0], sizes = [32, 7], strides = [1, 1]} : vector<32x16xf32> to vector<32x7xf32>
    %29 = tpu.concatenate %27, %28 in 1 : vector<32x1xf32>, vector<32x7xf32> -> vector<32x8xf32>
    %cst_18 = arith.constant 0.000000e+00 : f32
    %30 = vector.broadcast %cst_18 : f32 to vector<32x1xf32>
    %31 = vector.extract_strided_slice %26 {offsets = [0, 8], sizes = [32, 7], strides = [1, 1]} : vector<32x16xf32> to vector<32x7xf32>
    %32 = tpu.concatenate %30, %31 in 1 : vector<32x1xf32>, vector<32x7xf32> -> vector<32x8xf32>
    %33 = tpu.concatenate %29, %32 in 1 : vector<32x8xf32>, vector<32x8xf32> -> vector<32x16xf32>
    %34 = vector.extract_strided_slice %26 {offsets = [0, 0], sizes = [32, 8], strides = [1, 1]} : vector<32x16xf32> to vector<32x8xf32>
    %35 = vector.extract_strided_slice %26 {offsets = [0, 8], sizes = [32, 8], strides = [1, 1]} : vector<32x16xf32> to vector<32x8xf32>
    %36 = tpu.concatenate %34, %35 in 1 : vector<32x8xf32>, vector<32x8xf32> -> vector<32x16xf32>
    %37 = vector.extract_strided_slice %26 {offsets = [0, 1], sizes = [32, 7], strides = [1, 1]} : vector<32x16xf32> to vector<32x7xf32>
    %cst_19 = arith.constant 0.000000e+00 : f32
    %38 = vector.broadcast %cst_19 : f32 to vector<32x1xf32>
    %39 = tpu.concatenate %37, %38 in 1 : vector<32x7xf32>, vector<32x1xf32> -> vector<32x8xf32>
    %40 = vector.extract_strided_slice %26 {offsets = [0, 9], sizes = [32, 7], strides = [1, 1]} : vector<32x16xf32> to vector<32x7xf32>
    %cst_20 = arith.constant 0.000000e+00 : f32
    %41 = vector.broadcast %cst_20 : f32 to vector<32x1xf32>
    %42 = tpu.concatenate %40, %41 in 1 : vector<32x7xf32>, vector<32x1xf32> -> vector<32x8xf32>
    %43 = tpu.concatenate %39, %42 in 1 : vector<32x8xf32>, vector<32x8xf32> -> vector<32x16xf32>
    %44 = tpu.concatenate %33, %36, %43 in 0 : vector<32x16xf32>, vector<32x16xf32>, vector<32x16xf32> -> vector<96x16xf32>
    %c0_21 = arith.constant 0 : index
    %c0_22 = arith.constant 0 : index
    %45 = vector.load %arg4[%c0_21, %c0_22] : memref<32x96xf32, #tpu.memory_space<vmem>>, vector<32x96xf32>
    %cst_23 = arith.constant dense<0.000000e+00> : vector<32x16xf32>
    %46 = tpu.matmul %45, %44, %cst_23 {dimension_numbers = #tpu.dot_dimension_numbers<[1], [0], [0], [1], [0, 0, 1, 1], [], []>} : vector<32x96xf32>, vector<96x16xf32>, vector<32x16xf32> -> vector<32x16xf32>
    %c0_24 = arith.constant 0 : index
    %c0_25 = arith.constant 0 : index
    %47 = vector.load %arg5[%c0_24, %c0_25] : memref<32x1xf32, #tpu.memory_space<vmem>>, vector<32x1xf32>
    %48 = vector.broadcast %47 : vector<32x1xf32> to vector<32x16xf32>
    %49 = arith.addf %46, %48 : vector<32x16xf32>
    %cst_26 = arith.constant 0.000000e+00 : f32
    %50 = vector.broadcast %cst_26 : f32 to vector<32x16xf32>
    %51 = arith.maximumf %49, %50 : vector<32x16xf32>
    %c0_27 = arith.constant 0 : index
    %c0_28 = arith.constant 0 : index
    %52 = vector.load %arg8[%c0_27, %c0_28] : memref<32x32xf32, #tpu.memory_space<vmem>>, vector<32x32xf32>
    %cst_29 = arith.constant dense<0.000000e+00> : vector<32x16xf32>
    %53 = tpu.matmul %52, %51, %cst_29 {dimension_numbers = #tpu.dot_dimension_numbers<[1], [0], [0], [1], [0, 0, 1, 1], [], []>, precision = #tpu.contract_precision<fp32>} : vector<32x32xf32>, vector<32x16xf32>, vector<32x16xf32> -> vector<32x16xf32>
    %54 = vector.extract_strided_slice %53 {offsets = [0, 0], sizes = [16, 16], strides = [1, 1]} : vector<32x16xf32> to vector<16x16xf32>
    %55 = vector.extract_strided_slice %53 {offsets = [16, 0], sizes = [16, 16], strides = [1, 1]} : vector<32x16xf32> to vector<16x16xf32>
    %56 = arith.maximumf %54, %55 : vector<16x16xf32>
    %c0_30 = arith.constant 0 : index
    %c0_31 = arith.constant 0 : index
    %57 = vector.load %arg9[%c0_30, %c0_31] : memref<16x16xf32, #tpu.memory_space<vmem>>, vector<16x16xf32>
    %cst_32 = arith.constant dense<0.000000e+00> : vector<16x16xf32>
    %58 = tpu.matmul %56, %57, %cst_32 {dimension_numbers = #tpu.dot_dimension_numbers<[1], [0], [0], [1], [0, 0, 1, 1], [], []>, precision = #tpu.contract_precision<fp32>} : vector<16x16xf32>, vector<16x16xf32>, vector<16x16xf32> -> vector<16x16xf32>
    %59 = vector.extract_strided_slice %58 {offsets = [0, 0], sizes = [16, 8], strides = [1, 1]} : vector<16x16xf32> to vector<16x8xf32>
    %60 = vector.extract_strided_slice %58 {offsets = [0, 8], sizes = [16, 8], strides = [1, 1]} : vector<16x16xf32> to vector<16x8xf32>
    %61 = arith.maximumf %59, %60 : vector<16x8xf32>
    %62 = vector.extract_strided_slice %61 {offsets = [0, 0], sizes = [16, 4], strides = [1, 1]} : vector<16x8xf32> to vector<16x4xf32>
    %c0_33 = arith.constant 0 : index
    %c0_34 = arith.constant 0 : index
    %c0_35 = arith.constant 0 : index
    %63 = vector.load %arg10[%c0_33, %c0_34, %c0_35] : memref<2x16x4xf32, #tpu.memory_space<vmem>>, vector<1x16x4xf32>
    %64 = vector.shape_cast %63 : vector<1x16x4xf32> to vector<16x4xf32>
    %65 = vector.shape_cast %62 : vector<16x4xf32> to vector<1x16x4xf32>
    tpu.vector_store %arg10[%c0_33, %c0_34, %c0_35], %65 {strides = array<i32>} : memref<2x16x4xf32, #tpu.memory_space<vmem>>, vector<1x16x4xf32>,
    %66 = vector.extract_strided_slice %61 {offsets = [0, 4], sizes = [16, 4], strides = [1, 1]} : vector<16x8xf32> to vector<16x4xf32>
    %c1_36 = arith.constant 1 : index
    %c0_37 = arith.constant 0 : index
    %c0_38 = arith.constant 0 : index
    %67 = vector.load %arg10[%c1_36, %c0_37, %c0_38] : memref<2x16x4xf32, #tpu.memory_space<vmem>>, vector<1x16x4xf32>
    %68 = vector.shape_cast %67 : vector<1x16x4xf32> to vector<16x4xf32>
    %69 = vector.shape_cast %66 : vector<16x4xf32> to vector<1x16x4xf32>
    tpu.vector_store %arg10[%c1_36, %c0_37, %c0_38], %69 {strides = array<i32>} : memref<2x16x4xf32, #tpu.memory_space<vmem>>, vector<1x16x4xf32>,
    return
  }
  func.func @transform_0(%arg0: i32) -> (i32, i32) {
    %c0_i32 = arith.constant 0 : i32
    %c0_i32_0 = arith.constant 0 : i32
    %c0_i32_1 = arith.constant 0 : i32
    return %c0_i32, %c0_i32_0 : i32, i32
  }
  func.func @transform_1(%arg0: i32) -> (i32, i32) {
    %c0_i32 = arith.constant 0 : i32
    %c0_i32_0 = arith.constant 0 : i32
    %c0_i32_1 = arith.constant 0 : i32
    return %c0_i32, %c0_i32_0 : i32, i32
  }
  func.func @transform_2(%arg0: i32) -> (i32, i32) {
    %c0_i32 = arith.constant 0 : i32
    %c0_i32_0 = arith.constant 0 : i32
    %c0_i32_1 = arith.constant 0 : i32
    return %c0_i32, %c0_i32_0 : i32, i32
  }
  func.func @transform_3(%arg0: i32) -> (i32, i32) {
    %c0_i32 = arith.constant 0 : i32
    %c0_i32_0 = arith.constant 0 : i32
    %c0_i32_1 = arith.constant 0 : i32
    return %c0_i32, %c0_i32_0 : i32, i32
  }
  func.func @transform_4(%arg0: i32) -> (i32, i32) {
    %c0_i32 = arith.constant 0 : i32
    %c0_i32_0 = arith.constant 0 : i32
    %c0_i32_1 = arith.constant 0 : i32
    return %c0_i32, %c0_i32_0 : i32, i32
  }
  func.func @transform_5(%arg0: i32) -> (i32, i32) {
    %c0_i32 = arith.constant 0 : i32
    %c0_i32_0 = arith.constant 0 : i32
    %c0_i32_1 = arith.constant 0 : i32
    return %c0_i32, %c0_i32_0 : i32, i32
  }
  func.func @transform_6(%arg0: i32) -> (i32, i32) {
    %c0_i32 = arith.constant 0 : i32
    %c0_i32_0 = arith.constant 0 : i32
    %c0_i32_1 = arith.constant 0 : i32
    return %c0_i32, %c0_i32_0 : i32, i32
  }
  func.func @transform_7(%arg0: i32) -> (i32, i32) {
    %c0_i32 = arith.constant 0 : i32
    %c0_i32_0 = arith.constant 0 : i32
    %c0_i32_1 = arith.constant 0 : i32
    return %c0_i32, %c0_i32_0 : i32, i32
  }
  func.func @transform_8(%arg0: i32) -> (i32, i32) {
    %c0_i32 = arith.constant 0 : i32
    %c0_i32_0 = arith.constant 0 : i32
    %c0_i32_1 = arith.constant 0 : i32
    return %c0_i32, %c0_i32_0 : i32, i32
  }
  func.func @transform_9(%arg0: i32) -> (i32, i32, i32) {
    %c0_i32 = arith.constant 0 : i32
    %c0_i32_0 = arith.constant 0 : i32
    %c0_i32_1 = arith.constant 0 : i32
    %c0_i32_2 = arith.constant 0 : i32
    return %c0_i32, %c0_i32_0, %c0_i32_1 : i32, i32, i32
  }
}

</mosaic_0001>

<bundles_post_ra>
// kernel: conv2d_block_toFC_pallas.1
= control target key start
LH: loop header
LB: loop body
LE: loop exit
PB: predicated region body
PF: predicated region fallthrough
CT: control target
= control target key end

     0   :  { %v4491_v3 = vmov 0.0|0.0   ;;  %s4492_s25 = smov 126   ;;  %s4493_s26 = smov 125   ;;  %vm233_vm0 = vcmask 523264   ;;  %v4496_v14 = vmov 0   ;;  %vm72_vm1 = vcmask 130048   ;;  %s5221_s0 = inlined_call_operand.vmem [shape: f32[64,36], index: 0, kind: input, shape index: {}]   ;;  %s5222_s1 = inlined_call_operand.vmem [shape: f32[64,192], index: 1, kind: input, shape index: {}]   ;;  %s5223_s2 = inlined_call_operand.vmem [shape: f32[64,1], index: 2, kind: input, shape index: {}]   ;;  %s5224_s5 = inlined_call_operand.vmem [shape: f32[64,64], index: 5, kind: input, shape index: {}]   ;;  %s5225_s6 = inlined_call_operand.vmem [shape: f32[32,32], index: 6, kind: input, shape index: {}]   ;;  %s5226_s4 = inlined_call_operand.vmem [shape: f32[32,1], index: 4, kind: input, shape index: {}]   ;;  %s5227_s3 = inlined_call_operand.vmem [shape: f32[32,96], index: 3, kind: input, shape index: {}]   ;;  %s5228_s7 = inlined_call_operand.vmem [shape: f32[32,32], index: 7, kind: input, shape index: {}]   ;;  %s5229_s8 = inlined_call_operand.vmem [shape: f32[16,16], index: 8, kind: input, shape index: {}]   ;;  %s5230_s9 = inlined_call_operand.vmem [shape: f32[2,16,4], index: 9, kind: output, shape index: {}]  }
   0x1   :  { %v4556_v0 = vld [vmem:[%s5221_s0 + $0x20] sm:$0xff]  ;;  %v4561_v1 = vld [vmem:[%s5221_s0 + $0x28] sm:$0xff]  ;;  %3961 = vmatprep.subr.bf16.mxu0 %v4491_v3  ;;  %v4577_v6 = vld [vmem:[%s5221_s0 + $0x30] sm:$0xff]  ;;  %s4494_s27 = smov 127   ;;  %4419 = vset.pattern.permute.xlu0 %v4496_v14  ;;  %vm1249_vm2 = vcmask 261120   ;;  %s4498_s14 = smov 121  }
   0x2   :  { %v4566_v2 = vld [vmem:[%s5221_s0] sm:$0xff]  ;;  %v4349_v4 = vpack.i.bf16 %v4561_v1, %v4556_v0  ;;  %v33_v5 = vld [vmem:[%s5221_s0 + $0x8] sm:$0xff]  ;;  %v4582_v7 = vld [vmem:[%s5221_s0 + $0x38] sm:$0xff]  ;;  %4420 = vset.pattern.permute.xlu1 %v4496_v14  ;;  %s4500_s15 = smov 1   ;;  %vm1912_vm3 = vcmask 7168   ;;  %vm1966_vm4 = vcmask 56320  }
   0x3   :  { %v4339_v8 = vpack.i.bf16 %v33_v5, %v4566_v2  ;;  %v4588_v9 = vld [vmem:[%s5221_s0 + $0x10] sm:$0xff]  ;;  %v4593_v10 = vld [vmem:[%s5221_s0 + $0x18] sm:$0xff]  ;;  %v4354_v11 = vpack.i.bf16 %v4582_v7, %v4577_v6  ;;  %s4495_s0 = smov 124   ;;  %v170_v13 = vld [vmem:[%s5222_s1 + $0x8] sm:$0xff]  ;;  %vm2035_vm5 = vcmask 785408   ;;  %vm1949_vm6 = vcmask 64512  }
   0x4   :  { %4350 = vrot.lane.b32.xlu1 %v4349_v4, %s4492_s25  ;;  %v4344_v12 = vpack.i.bf16 %v4593_v10, %v4588_v9  ;;  %3307 = vmatprep.mubr.msk.f32.mxu0 %vm233_vm0, %v170_v13  ;;  %v185_v15 = vld [vmem:[%s5223_s2] sm:$0xff]  ;;  %v186_v16 = vld [vmem:[%s5223_s2 + $0x8] sm:$0xff]  ;;  %v187_v17 = vld [vmem:[%s5223_s2 + $0x10] sm:$0xff]  ;;  %vm3289_vm7 = vcmask 31744  }
   0x5   :  { %4340 = vrot.lane.b32.xlu0 %v4339_v8, %s4492_s25  ;;  %v188_v18 = vld [vmem:[%s5223_s2 + $0x18] sm:$0xff]  ;;  %v189_v19 = vld [vmem:[%s5223_s2 + $0x20] sm:$0xff]  ;;  %v190_v20 = vld [vmem:[%s5223_s2 + $0x28] sm:$0xff] }
   0x6   :  { %v191_v21 = vld [vmem:[%s5223_s2 + $0x30] sm:$0xff]  ;;  %v192_v22 = vld [vmem:[%s5223_s2 + $0x38] sm:$0xff] }
   0x8   :  { %4355 = vrot.lane.b32.xlu1 %v4354_v11, %s4492_s25 }
   0x9   :  { %4345 = vrot.lane.b32.xlu0 %v4344_v12, %s4492_s25 }
   0xc   :  { %4365 = vrot.lane.b32.xlu1 %v4339_v8, %s4493_s26 }
   0xd   :  { %4360 = vrot.lane.b32.xlu0 %v4339_v8, %s4494_s27 }
  0x10   :  { %4375 = vrot.lane.b32.xlu1 %v4344_v12, %s4493_s26 }
  0x11   :  { %4370 = vrot.lane.b32.xlu0 %v4344_v12, %s4494_s27 }
  0x14   :  { %4385 = vrot.lane.b32.xlu1 %v4349_v4, %s4493_s26 }
  0x15   :  { %4380 = vrot.lane.b32.xlu0 %v4349_v4, %s4494_s27 }
  0x18   :  { %4395 = vrot.lane.b32.xlu1 %v4354_v11, %s4493_s26 }
  0x19   :  { %4390 = vrot.lane.b32.xlu0 %v4354_v11, %s4494_s27 }
  0x1c   :  { %4405 = vrot.lane.b32.xlu1 %v4344_v12, %s4495_s0 }
  0x1d   :  { %4400 = vrot.lane.b32.xlu0 %v4339_v8, %s4495_s0 }
  0x20   :  { %4415 = vrot.lane.b32.xlu1 %v4354_v11, %s4495_s0 }
  0x21   :  { %4410 = vrot.lane.b32.xlu0 %v4349_v4, %s4495_s0 }
  0x24   :  { %200 = vperm.xlu1 %4420, %v186_v16  }
  0x25   :  { %195 = vperm.xlu0 %4419, %v185_v15  }
  0x28   :  { %205 = vperm.xlu1 %4420, %v187_v17  }
  0x29   :  { %210 = vperm.xlu0 %4419, %v188_v18  }
  0x2c   :  { %215 = vperm.xlu1 %4420, %v189_v19  }
  0x2d   :  { %220 = vperm.xlu0 %4419, %v190_v20  }
  0x30   :  { %225 = vperm.xlu1 %4420, %v191_v21  }
  0x31   :  { %230 = vperm.xlu0 %4419, %v192_v22  }
  0x76   :  { %v4635_v23 = vpop.permute.xlu1 %4350 }
  0x77   :  { %v4637_v24 = vpop.permute.xlu0 %4340  ;;  %v4353_v27 = vunpack.i.h.bf16 %v4635_v23  ;;  %v4352_v28 = vunpack.i.l.bf16 %v4635_v23  ;;  %v169_v23 = vld [vmem:[%s5222_s1] sm:$0xff] }
  0x78   :  { %v4343_v25 = vunpack.i.h.bf16 %v4637_v24  ;;  %v4342_v26 = vunpack.i.l.bf16 %v4637_v24 }
  0x79   :  { %v77_v36 = vsel %vm72_vm1, %v4556_v0, %v4352_v28  ;;  %v78_v37 = vsel %vm72_vm1, %v4561_v1, %v4353_v27 }
  0x7a   :  { %v4643_v29 = vpop.permute.xlu1 %4355  ;;  %v73_v30 = vsel %vm72_vm1, %v4566_v2, %v4342_v26  ;;  %v74_v31 = vsel %vm72_vm1, %v33_v5, %v4343_v25  ;;  %v3968_v45 = vpack.c.bf16 %v78_v37, %v77_v36 }
  0x7b   :  { %v4652_v32 = vpop.permute.xlu0 %4345  ;;  %v3962_v33 = vpack.c.bf16 %v74_v31, %v73_v30  ;;  %v4358_v38 = vunpack.i.h.bf16 %v4643_v29  ;;  %v4357_v39 = vunpack.i.l.bf16 %v4643_v29  ;;  %v171_v29 = vld [vmem:[%s5222_s1 + $0x10] sm:$0xff] }
  0x7c   :  { %v4348_v34 = vunpack.i.h.bf16 %v4652_v32  ;;  %v4347_v35 = vunpack.i.l.bf16 %v4652_v32 }
  0x7d   :  { %3963 = vmatpush1.bf16.msra.mxu0 %v3962_v33  ;;  %v79_v51 = vsel %vm72_vm1, %v4577_v6, %v4357_v39  ;;  %v80_v52 = vsel %vm72_vm1, %v4582_v7, %v4358_v38 }
  0x7e   :  { %v4366_v40 = vpop.permute.xlu1 %4365  ;;  %3964 = vmatprep.subr.bf16.mxu0 %v4491_v3  ;;  %v75_v41 = vsel %vm72_vm1, %v4588_v9, %v4347_v35  ;;  %v76_v42 = vsel %vm72_vm1, %v4593_v10, %v4348_v34  ;;  %v3971_v54 = vpack.c.bf16 %v80_v52, %v79_v51  ;;  %v177_v51 = vld [vmem:[%s5222_s1 + $0x40] sm:$0xff]  ;;  %v180_v52 = vld [vmem:[%s5222_s1 + $0x58] sm:$0xff] }
  0x7f   :  { %v4361_v43 = vpop.permute.xlu0 %4360  ;;  %v3965_v44 = vpack.c.bf16 %v76_v42, %v75_v41  ;;  %v4368_v46 = vunpack.i.h.bf16 %v4366_v40  ;;  %v4367_v47 = vunpack.i.l.bf16 %v4366_v40 }
  0x80   :  { %v4363_v48 = vunpack.i.h.bf16 %v4361_v43  ;;  %v4362_v49 = vunpack.i.l.bf16 %v4361_v43 }
  0x81   :  { %3966 = vmatpush1.bf16.msra.mxu0 %v3965_v44 }
  0x82   :  { %v4376_v50 = vpop.permute.xlu1 %4375  ;;  %3967 = vmatprep.subr.bf16.mxu0 %v4491_v3  ;;  %v129_v55 = vsel %vm72_vm1, %v4362_v49, %v4367_v47  ;;  %v130_v56 = vsel %vm72_vm1, %v4363_v48, %v4368_v46  ;;  %v175_v49 = vld [vmem:[%s5222_s1 + $0x30] sm:$0xff] }
  0x83   :  { %v4371_v53 = vpop.permute.xlu0 %4370  ;;  %v4378_v57 = vunpack.i.h.bf16 %v4376_v50  ;;  %v4377_v58 = vunpack.i.l.bf16 %v4376_v50  ;;  %v3974_v63 = vpack.c.bf16 %v130_v56, %v129_v55  ;;  %v178_v50 = vld [vmem:[%s5222_s1 + $0x48] sm:$0xff]  ;;  %v181_v55 = vld [vmem:[%s5222_s1 + $0x60] sm:$0xff]  ;;  %v184_v56 = vld [vmem:[%s5222_s1 + $0x78] sm:$0xff] }
  0x84   :  { %v4373_v59 = vunpack.i.h.bf16 %v4371_v53  ;;  %v4372_v60 = vunpack.i.l.bf16 %v4371_v53  ;;  %v179_v53 = vld [vmem:[%s5222_s1 + $0x50] sm:$0xff] }
  0x85   :  { %3969 = vmatpush1.bf16.msra.mxu0 %v3968_v45 }
  0x86   :  { %3970 = vmatprep.subr.bf16.mxu0 %v4491_v3  ;;  %v4386_v61 = vpop.permute.xlu1 %4385  ;;  %v131_v5 = vsel %vm72_vm1, %v4372_v60, %v4377_v58  ;;  %v132_v6 = vsel %vm72_vm1, %v4373_v59, %v4378_v57  ;;  %v183_v57 = vld [vmem:[%s5222_s1 + $0x70] sm:$0xff]  ;;  %v371_v58 = vld [vmem:[%s5224_s5] sm:$0xff] }
  0x87   :  { %v4381_v62 = vpop.permute.xlu0 %4380  ;;  %v4388_v0 = vunpack.i.h.bf16 %v4386_v61  ;;  %v4387_v1 = vunpack.i.l.bf16 %v4386_v61  ;;  %v3977_v9 = vpack.c.bf16 %v132_v6, %v131_v5  ;;  %v380_v59 = vsel %vm233_vm0, %v371_v58, 0  ;;  %v374_v58 = vld [vmem:[%s5224_s5 + $0x18] sm:$0xff] }
  0x88   :  { %v4383_v2 = vunpack.i.h.bf16 %v4381_v62  ;;  %v4382_v4 = vunpack.i.l.bf16 %v4381_v62  ;;  %v4781_v60 = vand.u32 4294901760, %v380_v59 }
  0x89   :  { %3972 = vmatpush1.bf16.msra.mxu0 %v3971_v54  ;;  %v182_v54 = vld [vmem:[%s5222_s1 + $0x68] sm:$0xff] }
  0x8a   :  { %3973 = vmatprep.subr.bf16.mxu0 %v4491_v3  ;;  %v4396_v8 = vpop.permute.xlu1 %4395  ;;  %v133_v10 = vsel %vm72_vm1, %v4382_v4, %v4387_v1  ;;  %v134_v11 = vsel %vm72_vm1, %v4383_v2, %v4388_v0  ;;  %v4784_v61 = vsub.f32 %v380_v59, %v4781_v60 }
  0x8b   :  { %v4391_v7 = vpop.permute.xlu0 %4390  ;;  %v4398_v12 = vunpack.i.h.bf16 %v4396_v8  ;;  %v4397_v13 = vunpack.i.l.bf16 %v4396_v8  ;;  %v3980_v17 = vpack.c.bf16 %v134_v11, %v133_v10 }
  0x8c   :  { %v4393_v14 = vunpack.i.h.bf16 %v4391_v7  ;;  %v4392_v15 = vunpack.i.l.bf16 %v4391_v7  ;;  %v478_v62 = vand.u32 4294901760, %v4784_v61 }
  0x8d   :  { %3975 = vmatpush1.bf16.msra.mxu0 %v3974_v63 }
  0x8e   :  { %3976 = vmatprep.subr.bf16.mxu0 %v4491_v3  ;;  %v135_v18 = vsel %vm72_vm1, %v4392_v15, %v4397_v13  ;;  %v136_v19 = vsel %vm72_vm1, %v4393_v14, %v4398_v12  ;;  %v4406_v22 = vpop.permute.xlu1 %4405  ;;  %v479_v63 = vsub.f32 %v4784_v61, %v478_v62  ;;  %v1245_v13 = vld [vmem:[%s5225_s6] sm:$0xff]  ;;  %v1246_v14 = vld [vmem:[%s5225_s6 + $0x8] sm:$0xff] }
  0x8f   :  { %v4401_v16 = vpop.permute.xlu0 %4400  ;;  %v3983_v30 = vpack.c.bf16 %v136_v19, %v135_v18  ;;  %v4408_v31 = vunpack.i.h.bf16 %v4406_v22  ;;  %v4407_v33 = vunpack.i.l.bf16 %v4406_v22  ;;  %v1266_v18 = vand.u32 4294901760, %v1246_v14 }
  0x90   :  { %v4403_v20 = vunpack.i.h.bf16 %v4401_v16  ;;  %v4402_v21 = vunpack.i.l.bf16 %v4401_v16  ;;  %v480_v0 = vand.u32 4294901760, %v479_v63 }
  0x91   :  { %3978 = vmatpush1.bf16.msra.mxu0 %v3977_v9  ;;  %v163_v44 = vsel %vm72_vm1, %v4347_v35, %v4407_v33  ;;  %v164_v45 = vsel %vm72_vm1, %v4348_v34, %v4408_v31 }
  0x92   :  { %3979 = vmatprep.subr.bf16.mxu0 %v4491_v3  ;;  %v161_v36 = vsel %vm72_vm1, %v4342_v26, %v4402_v21  ;;  %v162_v37 = vsel %vm72_vm1, %v4343_v25, %v4403_v20  ;;  %v4416_v26 = vpop.permute.xlu1 %4415  ;;  %v3989_v24 = vpack.c.bf16 %v164_v45, %v163_v44  ;;  %3569 = vmatprep.mubr.f32.mxu1 %v480_v0 }
  0x93   :  { %v4411_v40 = vpop.permute.xlu0 %4410  ;;  %v3986_v41 = vpack.c.bf16 %v162_v37, %v161_v36  ;;  %v4418_v25 = vunpack.i.h.bf16 %v4416_v26  ;;  %v4417_v46 = vunpack.i.l.bf16 %v4416_v26  ;;  %v4800_v36 = vsub.f32 %v1246_v14, %v1266_v18 }
  0x94   :  { %v4413_v42 = vunpack.i.h.bf16 %v4411_v40  ;;  %v4412_v43 = vunpack.i.l.bf16 %v4411_v40 }
  0x95   :  { %3981 = vmatpush1.bf16.msra.mxu0 %v3980_v17  ;;  %v167_v34 = vsel %vm72_vm1, %v4357_v39, %v4417_v46  ;;  %v168_v35 = vsel %vm72_vm1, %v4358_v38, %v4418_v25  ;;  %v173_v38 = vld [vmem:[%s5222_s1 + $0x20] sm:$0xff]  ;;  %v176_v39 = vld [vmem:[%s5222_s1 + $0x38] sm:$0xff]  ;;  %v1263_v17 = vand.u32 4294901760, %v1245_v13 }
  0x96   :  { %3982 = vmatprep.subr.bf16.mxu0 %v4491_v3  ;;  %v165_v47 = vsel %vm72_vm1, %v4352_v28, %v4412_v43  ;;  %v166_v48 = vsel %vm72_vm1, %v4353_v27, %v4413_v42  ;;  %v3995_v28 = vpack.c.bf16 %v168_v35, %v167_v34  ;;  %v172_v27 = vld [vmem:[%s5222_s1 + $0x18] sm:$0xff]  ;;  %v372_v42 = vld [vmem:[%s5224_s5 + $0x8] sm:$0xff] }
  0x97   :  { %v3992_v32 = vpack.c.bf16 %v166_v48, %v165_v47  ;;  %v4796_v31 = vpack.c.bf16 %v1266_v18, %v1263_v17  ;;  %v4798_v33 = vsub.f32 %v1245_v13, %v1263_v17 }
  0x99   :  { %3984 = vmatpush1.bf16.msra.mxu0 %v3983_v30  ;;  %v1374_v26 = vand.u32 4294901760, %v4798_v33 }
  0x9a   :  { %3985 = vmatprep.subr.bf16.mxu0 %v4491_v3 }
  0x9b   :  { %v1375_v35 = vsub.f32 %v4798_v33, %v1374_v26 }
  0x9d   :  { %3987 = vmatpush1.bf16.msra.mxu0 %v3986_v41 }
  0x9e   :  { %3988 = vmatprep.subr.bf16.mxu0 %v4491_v3 }
  0xa1   :  { %3990 = vmatpush1.bf16.msra.mxu0 %v3989_v24  ;;  %v1381_v24 = vand.u32 4294901760, %v4800_v36 }
  0xa2   :  { %3991 = vmatprep.subr.bf16.mxu0 %v4491_v3 }
  0xa3   :  { %v201_v4 = vpop.permute.xlu1 %200 }
  0xa4   :  { %v196_v1 = vpop.permute.xlu0 %195 }
  0xa5   :  { %3993 = vmatpush1.bf16.msra.mxu0 %v3992_v32  ;;  %v383_v32 = vsel %vm233_vm0, %v372_v42, 0 }
  0xa6   :  { %3994 = vmatprep.subr.bf16.mxu0 %v4491_v3  ;;  %v174_v3 = vld [vmem:[%s5222_s1 + $0x28] sm:$0xff]  ;;  %v4828_v59 = vand.u32 4294901760, %v383_v32  ;;  %s4499_s1 = smov 119  }
  0xa7   :  { %v206_v12 = vpop.permute.xlu1 %205 }
  0xa8   :  { %v211_v43 = vpop.permute.xlu0 %210  ;;  %v4847_v17 = vsub.f32 %v383_v32, %v4828_v59 }
  0xa9   :  { %3996 = vmatpush1.bf16.msra.mxu0 %v3995_v28  ;;  %v1382_v28 = vsub.f32 %v4800_v36, %v1381_v24 }
  0xac   :  { %323 = vmatmul.mubr.f32.vlgmr.msra.gmra.mrb[0].mxu0 %v169_v23 }
  0xad   :  { %3308 = vmatprep.mubr.msk.f32.mxu0 %vm233_vm0, %v172_v27 }
  0xb0   :  { %328 = vmatmul.mubr.f32.gmra.mrb[2].mxu0 %v171_v29 }
  0xb1   :  { %3309 = vmatprep.mubr.msk.f32.mxu0 %vm233_vm0, %v174_v3  ;;  %v373_v3 = vld [vmem:[%s5224_s5 + $0x10] sm:$0xff] }
  0xb2   :  { %v386_v63 = vsel %vm233_vm0, %v373_v3, 0 }
  0xb3   :  { %v4849_v18 = vand.u32 4294901760, %v386_v63 }
  0xb4   :  { %333 = vmatmul.mubr.f32.gmra.mrb[4].mxu0 %v173_v38 }
  0xb5   :  { %3310 = vmatprep.mubr.msk.f32.mxu0 %vm233_vm0, %v176_v39  ;;  %v216_v39 = vpop.permute.xlu1 %215 }
  0xb8   :  { %338 = vmatmul.mubr.f32.gmra.mrb[6].mxu0 %v175_v49 }
  0xb9   :  { %3311 = vmatprep.mubr.msk.f32.mxu0 %vm233_vm0, %v178_v50 }
  0xbc   :  { %343 = vmatmul.mubr.f32.gmra.mrb[8].mxu0 %v177_v51  ;;  %v1376_v51 = vand.u32 4294901760, %v1375_v35  ;;  %v378_v35 = vld [vmem:[%s5224_s5 + $0x38] sm:$0xff] }
  0xbd   :  { %3312 = vmatprep.mubr.msk.f32.mxu0 %vm233_vm0, %v180_v52  ;;  %v1383_v52 = vand.u32 4294901760, %v1382_v28  ;;  %v488_v28 = vand.u32 4294901760, %v4847_v17 }
  0xbf   :  { %v4101_v0 = vpack.c.bf16 %v1383_v52, %v1376_v51 }
  0xc0   :  { %348 = vmatmul.mubr.f32.gmra.mrb[10].mxu0 %v179_v53 }
  0xc1   :  { %3313 = vmatprep.mubr.msk.f32.mxu0 %vm233_vm0, %v182_v54  ;;  %4102 = vmatprep.subr.bf16.mxu0 %v4101_v0 }
  0xc2   :  { %4104 = vmatpush3.bf16.msra.mxu0 %v4101_v0 }
  0xc4   :  { %353 = vmatmul.mubr.f32.gmra.mrb[12].mxu0 %v181_v55 }
  0xc5   :  { %3314 = vmatprep.mubr.msk.f32.mxu0 %vm233_vm0, %v184_v56 }
  0xc8   :  { %358 = vmatmul.mubr.f32.gmra.mrb[14].mxu0 %v183_v57 }
 0x17f   :  { %v324_v2 = vpop.f32.mrb[0].mxu0 }
 0x180   :  { %v325_v5 = vadd.f32 %v324_v2, %v196_v1  ;;  %v326_v6 = vpop.f32.mrb[1].mxu0 }
 0x181   :  { %v375_v6 = vld [vmem:[%s5224_s5 + $0x20] sm:$0xff] }
 0x182   :  { %v363_v7 = vmax.f32 %v325_v5, 0.0 }
 0x183   :  { %v329_v8 = vpop.f32.mrb[2].mxu0 }
 0x184   :  { %v404_v9 = vand.u32 4294901760, %v363_v7  ;;  %v330_v10 = vadd.f32 %v329_v8, %v201_v4  ;;  %v331_v11 = vpop.f32.mrb[3].mxu0 }
 0x186   :  { %v558_v15 = vsub.f32 %v363_v7, %v404_v9  ;;  %v364_v16 = vmax.f32 %v330_v10, 0.0  ;;  %v221_v7 = vpop.permute.xlu0 %220  ;;  %v389_v10 = vsel %vm233_vm0, %v374_v58, 0 }
 0x187   :  { %v334_v19 = vpop.f32.mrb[4].mxu0 }
 0x188   :  { %v559_v20 = vand.u32 4294901760, %v558_v15  ;;  %v407_v21 = vand.u32 4294901760, %v364_v16  ;;  %v335_v22 = vadd.f32 %v334_v19, %v206_v12  ;;  %v336_v30 = vpop.f32.mrb[5].mxu0  ;;  %v392_v19 = vsel %vm233_vm0, %v375_v6, 0 }
 0x189   :  { %v377_v30 = vld [vmem:[%s5224_s5 + $0x30] sm:$0xff] }
 0x18a   :  { %v4802_v37 = vpack.c.bf16 %v407_v21, %v404_v9  ;;  %v565_v40 = vsub.f32 %v364_v16, %v407_v21  ;;  %v365_v41 = vmax.f32 %v335_v22, 0.0  ;;  %v560_v45 = vsub.f32 %v558_v15, %v559_v20  ;;  %v231_v51 = vpop.permute.xlu0 %230 }
 0x18b   :  { %v339_v44 = vpop.f32.mrb[6].mxu0 }
 0x18c   :  { %v566_v25 = vand.u32 4294901760, %v565_v40  ;;  %v410_v46 = vand.u32 4294901760, %v365_v41  ;;  %v340_v47 = vadd.f32 %v339_v44, %v211_v43  ;;  %v341_v48 = vpop.f32.mrb[7].mxu0  ;;  %3998 = vmatprep.subr.bf16.mxu1 %v4802_v37  ;;  %v4812_v34 = vpack.c.bf16 %v565_v40, %v558_v15  ;;  %v376_v15 = vld [vmem:[%s5224_s5 + $0x28] sm:$0xff] }
 0x18d   :  { %4000 = vmatpush3.bf16.msra.mxu1 %v4802_v37  ;;  %v561_v50 = vand.u32 4294901760, %v560_v45  ;;  %v4857_v44 = vand.u32 4294901760, %v389_v10  ;;  %v395_v45 = vsel %vm233_vm0, %v376_v15, 0 }
 0x18e   :  { %v572_v23 = vsub.f32 %v365_v41, %v410_v46  ;;  %v366_v27 = vmax.f32 %v340_v47, 0.0  ;;  %v567_v29 = vsub.f32 %v565_v40, %v566_v25  ;;  %v4823_v38 = vpack.c.bf16 %v566_v25, %v559_v20  ;;  %v226_v41 = vpop.permute.xlu1 %225 }
 0x18f   :  { %v344_v49 = vpop.f32.mrb[8].mxu0 }
 0x190   :  { %v573_v53 = vand.u32 4294901760, %v572_v23  ;;  %v413_v54 = vand.u32 4294901760, %v366_v27  ;;  %v345_v55 = vadd.f32 %v344_v49, %v216_v39  ;;  %v346_v56 = vpop.f32.mrb[9].mxu0  ;;  %v568_v57 = vand.u32 4294901760, %v567_v29 }
 0x191   :  { %v398_v29 = vsel %vm233_vm0, %v377_v30, 0  ;;  %v401_v56 = vsel %vm233_vm0, %v378_v35, 0 }
 0x192   :  { %v4831_v1 = vpack.c.bf16 %v413_v54, %v410_v46  ;;  %v579_v2 = vsub.f32 %v366_v27, %v413_v54  ;;  %v367_v4 = vmax.f32 %v345_v55, 0.0  ;;  %v4833_v5 = vpack.c.bf16 %v568_v57, %v561_v50 }
 0x193   :  { %v349_v8 = vpop.f32.mrb[10].mxu0  ;;  %v574_v9 = vsub.f32 %v572_v23, %v573_v53  ;;  %v4867_v27 = vand.u32 4294901760, %v392_v19  ;;  %v4877_v55 = vand.u32 4294901760, %v395_v45  ;;  %v4899_v15 = vand.u32 4294901760, %v401_v56 }
 0x194   :  { %v580_v11 = vand.u32 4294901760, %v579_v2  ;;  %v416_v12 = vand.u32 4294901760, %v367_v4  ;;  %v350_v13 = vadd.f32 %v349_v8, %v221_v7  ;;  %v351_v14 = vpop.f32.mrb[11].mxu0  ;;  %4002 = vmatprep.subr.bf16.mxu1 %v4831_v1  ;;  %v4843_v16 = vpack.c.bf16 %v579_v2, %v572_v23 }
 0x195   :  { %4004 = vmatpush3.bf16.msra.mxu1 %v4831_v1  ;;  %v575_v43 = vand.u32 4294901760, %v574_v9  ;;  %v4865_v23 = vsub.f32 %v386_v63, %v4849_v18  ;;  %v4886_v6 = vsub.f32 %v392_v19, %v4867_v27  ;;  %v4888_v7 = vand.u32 4294901760, %v398_v29 }
 0x196   :  { %v586_v20 = vsub.f32 %v367_v4, %v416_v12  ;;  %v368_v21 = vmax.f32 %v350_v13, 0.0  ;;  %v581_v22 = vsub.f32 %v579_v2, %v580_v11  ;;  %v4855_v40 = vpack.c.bf16 %v580_v11, %v573_v53 }
 0x197   :  { %v354_v42 = vpop.f32.mrb[12].mxu0  ;;  %v4875_v53 = vsub.f32 %v389_v10, %v4857_v44  ;;  %v498_v4 = vand.u32 4294901760, %v4865_v23  ;;  %v4897_v14 = vsub.f32 %v395_v45, %v4877_v55 }
 0x198   :  { %v587_v25 = vand.u32 4294901760, %v586_v20  ;;  %v419_v46 = vand.u32 4294901760, %v368_v21  ;;  %v355_v47 = vadd.f32 %v354_v42, %v226_v41  ;;  %v356_v48 = vpop.f32.mrb[13].mxu0  ;;  %v582_v32 = vand.u32 4294901760, %v581_v22 }
 0x199   :  { %v508_v13 = vand.u32 4294901760, %v4875_v53  ;;  %v499_v30 = vsub.f32 %v4865_v23, %v498_v4  ;;  %v518_v41 = vand.u32 4294901760, %v4886_v6  ;;  %v4906_v42 = vsub.f32 %v398_v29, %v4888_v7 }
 0x19a   :  { %v4870_v3 = vpack.c.bf16 %v419_v46, %v416_v12  ;;  %v593_v39 = vsub.f32 %v368_v21, %v419_v46  ;;  %v369_v49 = vmax.f32 %v355_v47, 0.0  ;;  %v4872_v50 = vpack.c.bf16 %v582_v32, %v575_v43 }
 0x19b   :  { %v359_v52 = vpop.f32.mrb[14].mxu0  ;;  %v588_v54 = vsub.f32 %v586_v20, %v587_v25  ;;  %v489_v12 = vsub.f32 %v4847_v17, %v488_v28  ;;  %v509_v47 = vsub.f32 %v4875_v53, %v508_v13  ;;  %v528_v48 = vand.u32 4294901760, %v4897_v14 }
 0x19c   :  { %v594_v57 = vand.u32 4294901760, %v593_v39  ;;  %v422_v58 = vand.u32 4294901760, %v369_v49  ;;  %v360_v63 = vadd.f32 %v359_v52, %v231_v51  ;;  %v361_v0 = vpop.f32.mrb[15].mxu0  ;;  %4006 = vmatprep.subr.bf16.mxu1 %v4870_v3  ;;  %v4881_v2 = vpack.c.bf16 %v593_v39, %v586_v20 }
 0x19d   :  { %4008 = vmatpush3.bf16.msra.mxu1 %v4870_v3  ;;  %v589_v21 = vand.u32 4294901760, %v588_v54  ;;  %v490_v46 = vand.u32 4294901760, %v489_v12  ;;  %v519_v51 = vsub.f32 %v4886_v6, %v518_v41  ;;  %v538_v52 = vand.u32 4294901760, %v4906_v42 }
 0x19e   :  { %v600_v8 = vsub.f32 %v369_v49, %v422_v58  ;;  %v370_v9 = vmax.f32 %v360_v63, 0.0  ;;  %v595_v10 = vsub.f32 %v593_v39, %v594_v57  ;;  %v4890_v11 = vpack.c.bf16 %v594_v57, %v587_v25 }
 0x19f   :  { %v4916_v39 = vsub.f32 %v401_v56, %v4899_v15  ;;  %v500_v49 = vand.u32 4294901760, %v499_v30  ;;  %v529_v56 = vsub.f32 %v4897_v14, %v528_v48 }
 0x1a0   :  { %v601_v19 = vand.u32 4294901760, %v600_v8  ;;  %v425_v20 = vand.u32 4294901760, %v370_v9  ;;  %v596_v22 = vand.u32 4294901760, %v595_v10  ;;  %v539_v10 = vsub.f32 %v4906_v42, %v538_v52 }
 0x1a2   :  { %v4908_v43 = vpack.c.bf16 %v425_v20, %v422_v58  ;;  %v607_v25 = vsub.f32 %v370_v9, %v425_v20  ;;  %v4021_v45 = vpack.c.bf16 %v596_v22, %v589_v21  ;;  %v602_v35 = vsub.f32 %v600_v8, %v601_v19 }
 0x1a3   :  { %v510_v58 = vand.u32 4294901760, %v509_v47  ;;  %v520_v9 = vand.u32 4294901760, %v519_v51  ;;  %v540_v21 = vand.u32 4294901760, %v539_v10  ;;  %v4125_v10 = vpack.c.bf16 %v1381_v24, %v1374_v26 }
 0x1a4   :  { %v608_v32 = vand.u32 4294901760, %v607_v25  ;;  %4010 = vmatprep.subr.bf16.mxu1 %v4908_v43  ;;  %v4041_v29 = vpack.c.bf16 %v607_v25, %v600_v8  ;;  %v603_v63 = vand.u32 4294901760, %v602_v35  ;;  %v548_v8 = vand.u32 4294901760, %v4916_v39 }
 0x1a5   :  { %4012 = vmatpush3.bf16.msra.mxu1 %v4908_v43 }
 0x1a6   :  { %4014 = vmatprep.subr.bf16.mxu1 %v4833_v5  ;;  %v609_v54 = vsub.f32 %v607_v25, %v608_v32  ;;  %v4924_v57 = vpack.c.bf16 %v608_v32, %v601_v19  ;;  %v530_v19 = vand.u32 4294901760, %v529_v56  ;;  %v549_v20 = vsub.f32 %v4916_v39, %v548_v8 }
 0x1a8   :  { %3570 = vmatmul.mubr.f32.vlgmr.msra.gmra.mrb[0].mxu1 %v490_v46  ;;  %v610_v0 = vand.u32 4294901760, %v609_v54 }
 0x1a9   :  { %4016 = vmatpush3.bf16.msra.mxu1 %v4833_v5  ;;  %3572 = vmatprep.mubr.f32.mxu1 %v500_v49  ;;  %v550_v5 = vand.u32 4294901760, %v549_v20 }
 0x1aa   :  { %4018 = vmatprep.subr.bf16.mxu1 %v4872_v50  ;;  %v4025_v12 = vpack.c.bf16 %v610_v0, %v603_v63 }
 0x1ac   :  { %3573 = vmatmul.mubr.f32.gmra.mrb[2].mxu1 %v510_v58 }
 0x1ad   :  { %4020 = vmatpush3.bf16.msra.mxu1 %v4872_v50  ;;  %3575 = vmatprep.mubr.f32.mxu1 %v520_v9 }
 0x1ae   :  { %4022 = vmatprep.subr.bf16.mxu1 %v4021_v45 }
 0x1b0   :  { %3576 = vmatmul.mubr.f32.gmra.mrb[4].mxu1 %v530_v19 }
 0x1b1   :  { %4024 = vmatpush3.bf16.msra.mxu1 %v4021_v45  ;;  %3578 = vmatprep.mubr.f32.mxu1 %v540_v21 }
 0x1b2   :  { %4026 = vmatprep.subr.bf16.mxu1 %v4025_v12 }
 0x1b4   :  { %3579 = vmatmul.mubr.f32.gmra.mrb[6].mxu1 %v550_v5 }
 0x1b5   :  { %4028 = vmatpush3.bf16.msra.mxu1 %v4025_v12  ;;  %3597 = vmatprep.mubr.f32.mxu1 %v4781_v60 }
 0x1b6   :  { %4030 = vmatprep.subr.bf16.mxu1 %v4812_v34 }
 0x1b8   :  { %3598 = vmatmul.mubr.f32.vlgmr.msra.gmra.mrb[0].mxu1 %v4828_v59 }
 0x1b9   :  { %4032 = vmatpush3.bf16.msra.mxu1 %v4812_v34  ;;  %3600 = vmatprep.mubr.f32.mxu1 %v4849_v18 }
 0x1ba   :  { %4034 = vmatprep.subr.bf16.mxu1 %v4843_v16 }
 0x1bc   :  { %3601 = vmatmul.mubr.f32.gmra.mrb[2].mxu1 %v4857_v44 }
 0x1bd   :  { %4036 = vmatpush3.bf16.msra.mxu1 %v4843_v16  ;;  %3603 = vmatprep.mubr.f32.mxu1 %v4867_v27 }
 0x1be   :  { %4038 = vmatprep.subr.bf16.mxu1 %v4881_v2 }
 0x1c0   :  { %3604 = vmatmul.mubr.f32.gmra.mrb[4].mxu1 %v4877_v55 }
 0x1c1   :  { %4040 = vmatpush3.bf16.msra.mxu1 %v4881_v2  ;;  %3606 = vmatprep.mubr.f32.mxu1 %v4888_v7 }
 0x1c2   :  { %4042 = vmatprep.subr.bf16.mxu1 %v4041_v29 }
 0x1c4   :  { %3607 = vmatmul.mubr.f32.gmra.mrb[6].mxu1 %v4899_v15 }
 0x1c5   :  { %4044 = vmatpush3.bf16.msra.mxu1 %v4041_v29  ;;  %3625 = vmatprep.mubr.f32.mxu1 %v4784_v61  ;;  %v1248_v61 = vld [vmem:[%s5225_s6 + $0x18] sm:$0xff] }
 0x1c6   :  { %4046 = vmatprep.subr.bf16.mxu1 %v4802_v37 }
 0x1c8   :  { %3626 = vmatmul.mubr.f32.vlgmr.msra.gmra.mrb[0].mxu1 %v4847_v17 }
 0x1c9   :  { %4048 = vmatpush3.bf16.msra.mxu1 %v4802_v37  ;;  %3628 = vmatprep.mubr.f32.mxu1 %v4865_v23  ;;  %v4109_v23 = vpack.c.bf16 %v4800_v36, %v4798_v33 }
 0x1ca   :  { %4050 = vmatprep.subr.bf16.mxu1 %v4831_v1 }
 0x1cc   :  { %3629 = vmatmul.mubr.f32.gmra.mrb[2].mxu1 %v4875_v53 }
 0x1cd   :  { %4052 = vmatpush3.bf16.msra.mxu1 %v4831_v1  ;;  %3631 = vmatprep.mubr.f32.mxu1 %v4886_v6 }
 0x1ce   :  { %4054 = vmatprep.subr.bf16.mxu1 %v4870_v3 }
 0x1d0   :  { %3632 = vmatmul.mubr.f32.gmra.mrb[4].mxu1 %v4897_v14 }
 0x1d1   :  { %4056 = vmatpush3.bf16.msra.mxu1 %v4870_v3  ;;  %3634 = vmatprep.mubr.f32.mxu1 %v4906_v42 }
 0x1d2   :  { %4058 = vmatprep.subr.bf16.mxu1 %v4908_v43 }
 0x1d4   :  { %3635 = vmatmul.mubr.f32.gmra.mrb[6].mxu1 %v4916_v39 }
 0x1d5   :  { %4060 = vmatpush3.bf16.msra.mxu1 %v4908_v43  ;;  %3653 = vmatprep.mubr.f32.mxu1 %v478_v62 }
 0x1d6   :  { %4062 = vmatprep.subr.bf16.mxu1 %v4823_v38 }
 0x1d8   :  { %3654 = vmatmul.mubr.f32.vlgmr.msra.gmra.mrb[0].mxu1 %v488_v28 }
 0x1d9   :  { %4064 = vmatpush3.bf16.msra.mxu1 %v4823_v38  ;;  %3656 = vmatprep.mubr.f32.mxu1 %v498_v4 }
 0x1da   :  { %4066 = vmatprep.subr.bf16.mxu1 %v4855_v40 }
 0x1dc   :  { %3657 = vmatmul.mubr.f32.gmra.mrb[2].mxu1 %v508_v13 }
 0x1dd   :  { %4068 = vmatpush3.bf16.msra.mxu1 %v4855_v40  ;;  %3659 = vmatprep.mubr.f32.mxu1 %v518_v41 }
 0x1de   :  { %4070 = vmatprep.subr.bf16.mxu1 %v4890_v11 }
 0x1e0   :  { %3660 = vmatmul.mubr.f32.gmra.mrb[4].mxu1 %v528_v48 }
 0x1e1   :  { %4072 = vmatpush3.bf16.msra.mxu1 %v4890_v11  ;;  %3662 = vmatprep.mubr.f32.mxu1 %v538_v52 }
 0x1e2   :  { %4074 = vmatprep.subr.bf16.mxu1 %v4924_v57 }
 0x1e4   :  { %3663 = vmatmul.mubr.f32.gmra.mrb[6].mxu1 %v548_v8 }
 0x1e5   :  { %4076 = vmatpush3.bf16.msra.mxu1 %v4924_v57  ;;  %3681 = vmatprep.mubr.f32.mxu1 %v4781_v60 }
 0x1e6   :  { %4078 = vmatprep.subr.bf16.mxu1 %v4802_v37 }
 0x1e8   :  { %3682 = vmatmul.mubr.f32.vlgmr.msra.gmra.mrb[0].mxu1 %v4828_v59 }
 0x1e9   :  { %4080 = vmatpush3.bf16.msra.mxu1 %v4802_v37  ;;  %3684 = vmatprep.mubr.f32.mxu1 %v4849_v18  ;;  %v1272_v37 = vand.u32 4294901760, %v1248_v61 }
 0x1ea   :  { %4082 = vmatprep.subr.bf16.mxu1 %v4831_v1 }
 0x1ec   :  { %3685 = vmatmul.mubr.f32.gmra.mrb[2].mxu1 %v4857_v44 }
 0x1ed   :  { %4084 = vmatpush3.bf16.msra.mxu1 %v4831_v1  ;;  %3687 = vmatprep.mubr.f32.mxu1 %v4867_v27 }
 0x1ee   :  { %4086 = vmatprep.subr.bf16.mxu1 %v4870_v3 }
 0x1f0   :  { %3688 = vmatmul.mubr.f32.gmra.mrb[4].mxu1 %v4877_v55 }
 0x1f1   :  { %4088 = vmatpush3.bf16.msra.mxu1 %v4870_v3  ;;  %3690 = vmatprep.mubr.f32.mxu1 %v4888_v7 }
 0x1f2   :  { %4090 = vmatprep.subr.bf16.mxu1 %v4908_v43 }
 0x1f4   :  { %3691 = vmatmul.mubr.f32.gmra.mrb[6].mxu1 %v4899_v15 }
 0x1f5   :  { %4092 = vmatpush3.bf16.msra.mxu1 %v4908_v43  ;;  %3709 = vmatprep.mubr.f32.mxu1 %v4781_v60  ;;  %v1247_v60 = vld [vmem:[%s5225_s6 + $0x10] sm:$0xff]  ;;  %s4497_s6 = smov 112  }
 0x1f6   :  { %4094 = vmatprep.subr.bf16.mxu1 %v4796_v31  ;;  %v1269_v62 = vand.u32 4294901760, %v1247_v60 }
 0x1f8   :  { %3710 = vmatmul.mubr.f32.vlgmr.msra.gmra.mrb[0].mxu1 %v4828_v59  ;;  %v5025_v34 = vpack.c.bf16 %v1272_v37, %v1269_v62  ;;  %v1387_v38 = vsub.f32 %v1247_v60, %v1269_v62  ;;  %v1394_v59 = vsub.f32 %v1248_v61, %v1272_v37 }
 0x1f9   :  { %3712 = vmatprep.mubr.f32.mxu1 %v4849_v18  ;;  %4096 = vmatpush3.bf16.msra.mxu1 %v4796_v31 }
 0x1fa   :  { %v1388_v1 = vand.u32 4294901760, %v1387_v38  ;;  %v1395_v16 = vand.u32 4294901760, %v1394_v59  ;;  %4098 = vmatprep.subr.bf16.mxu1 %v5025_v34 }
 0x1fc   :  { %3713 = vmatmul.mubr.f32.gmra.mrb[2].mxu1 %v4857_v44  ;;  %v1389_v17 = vsub.f32 %v1387_v38, %v1388_v1  ;;  %v1396_v18 = vsub.f32 %v1394_v59, %v1395_v16  ;;  %v5031_v3 = vpack.c.bf16 %v1395_v16, %v1388_v1 }
 0x1fd   :  { %3715 = vmatprep.mubr.f32.mxu1 %v4867_v27  ;;  %4100 = vmatpush3.bf16.msra.mxu1 %v5025_v34  ;;  %v4113_v27 = vpack.c.bf16 %v1394_v59, %v1387_v38 }
 0x1fe   :  { %v1390_v40 = vand.u32 4294901760, %v1389_v17  ;;  %v1397_v44 = vand.u32 4294901760, %v1396_v18 }
 0x200   :  { %3716 = vmatmul.mubr.f32.gmra.mrb[4].mxu1 %v4877_v55  ;;  %v4105_v28 = vpack.c.bf16 %v1397_v44, %v1390_v40 }
 0x201   :  { %3718 = vmatprep.mubr.f32.mxu1 %v4888_v7 }
 0x202   :  { %4106 = vmatprep.subr.bf16.mxu0 %v4105_v28 }
 0x203   :  { %4108 = vmatpush3.bf16.msra.mxu0 %v4105_v28 }
 0x204   :  { %3719 = vmatmul.mubr.f32.gmra.mrb[6].mxu1 %v4899_v15  ;;  %4110 = vmatprep.subr.bf16.mxu0 %v4109_v23 }
 0x2cb   :  { %v3711_v50 = vpop.f32.mrb[0].mxu1 }
 0x2cc   :  { %v1195_v53 = vpop.f32.mrb[1].mxu1 }
 0x2cf   :  { %v3714_v55 = vpop.f32.mrb[2].mxu1 }
 0x2d0   :  { %v1207_v2 = vpop.f32.mrb[3].mxu1 }
 0x2d3   :  { %v3717_v4 = vpop.f32.mrb[4].mxu1 }
 0x2d4   :  { %v1242_v6 = vmax.f32 %v3711_v50, %v3717_v4  ;;  %v1219_v7 = vpop.f32.mrb[5].mxu1 }
 0x2d5   :  { %v1241_v11 = vmax.f32 %v1195_v53, %v1219_v7  ;;  %v2011_v53 = vld [vmem:[%s5226_s4] sm:$0xff] }
 0x2d6   :  { %v1254_v13 = vsel %vm1249_vm2, %v1242_v6, 0 }
 0x2d7   :  { %v5034_v14 = vand.u32 4294901760, %v1254_v13  ;;  %v1251_v15 = vsel %vm1249_vm2, %v1241_v11, 0  ;;  %v3720_v22 = vpop.f32.mrb[6].mxu1 }
 0x2d8   :  { %v1331_v30 = vand.u32 4294901760, %v1251_v15  ;;  %v1244_v41 = vmax.f32 %v3714_v55, %v3720_v22  ;;  %v1231_v42 = vpop.f32.mrb[7].mxu1  ;;  %v2013_v55 = vld [vmem:[%s5226_s4 + $0x10] sm:$0xff] }
 0x2d9   :  { %v1342_v43 = vsub.f32 %v1254_v13, %v5034_v14  ;;  %v1243_v25 = vmax.f32 %v1207_v2, %v1231_v42 }
 0x2da   :  { %v1332_v45 = vsub.f32 %v1251_v15, %v1331_v30  ;;  %v1260_v46 = vsel %vm1249_vm2, %v1244_v41, 0  ;;  %3743 = vmatprep.mubr.f32.mxu0 %v1331_v30 }
 0x2db   :  { %v1343_v47 = vand.u32 4294901760, %v1342_v43  ;;  %v1361_v48 = vand.u32 4294901760, %v1260_v46  ;;  %v1257_v32 = vsel %vm1249_vm2, %v1243_v25, 0  ;;  %3744 = vmatmul.mubr.f32.vlgmr.msra.gmra.mrb[16].mxu0 %v5034_v14 }
 0x2dc   :  { %v1351_v35 = vand.u32 4294901760, %v1257_v32  ;;  %4112 = vmatpush3.bf16.msra.mxu0 %v4109_v23  ;;  %v1333_v39 = vand.u32 4294901760, %v1332_v45 }
 0x2dd   :  { %v1344_v29 = vsub.f32 %v1342_v43, %v1343_v47  ;;  %v1362_v49 = vsub.f32 %v1260_v46, %v1361_v48  ;;  %4114 = vmatprep.subr.bf16.mxu0 %v4113_v27 }
 0x2de   :  { %v1352_v51 = vsub.f32 %v1257_v32, %v1351_v35  ;;  %3746 = vmatprep.mubr.f32.mxu0 %v1351_v35  ;;  %v1334_v52 = vsub.f32 %v1332_v45, %v1333_v39 }
 0x2df   :  { %3747 = vmatmul.mubr.f32.gmra.mrb[18].mxu0 %v1361_v48  ;;  %v1363_v54 = vand.u32 4294901760, %v1362_v49  ;;  %v1345_v56 = vand.u32 4294901760, %v1344_v29 }
 0x2e0   :  { %4116 = vmatpush3.bf16.msra.mxu0 %v4113_v27  ;;  %3757 = vmatprep.mubr.f32.mxu0 %v1332_v45  ;;  %v1335_v57 = vand.u32 4294901760, %v1334_v52  ;;  %v1353_v58 = vand.u32 4294901760, %v1352_v51  ;;  %v2012_v52 = vld [vmem:[%s5226_s4 + $0x8] sm:$0xff] }
 0x2e1   :  { %4118 = vmatprep.subr.bf16.mxu0 %v4796_v31  ;;  %v1364_v63 = vsub.f32 %v1362_v49, %v1363_v54 }
 0x2e2   :  { %3729 = vmatprep.mubr.f32.mxu1 %v1335_v57  ;;  %v1354_v0 = vsub.f32 %v1352_v51, %v1353_v58  ;;  %v2014_v57 = vld [vmem:[%s5226_s4 + $0x18] sm:$0xff] }
 0x2e3   :  { %3730 = vmatmul.mubr.f32.vlgmr.msra.gmra.mrb[8].mxu1 %v1345_v56  ;;  %3758 = vmatmul.mubr.f32.vlgmr.msra.gmra.mrb[16].mxu0 %v1342_v43  ;;  %v1365_v9 = vand.u32 4294901760, %v1364_v63 }
 0x2e4   :  { %3760 = vmatprep.mubr.f32.mxu0 %v1352_v51  ;;  %4120 = vmatpush3.bf16.msra.mxu0 %v4796_v31  ;;  %v1355_v8 = vand.u32 4294901760, %v1354_v0 }
 0x2e5   :  { %4122 = vmatprep.subr.bf16.mxu0 %v5025_v34 }
 0x2e6   :  { %3732 = vmatprep.mubr.f32.mxu1 %v1355_v8 }
 0x2e7   :  { %3733 = vmatmul.mubr.f32.gmra.mrb[10].mxu1 %v1365_v9  ;;  %3761 = vmatmul.mubr.f32.gmra.mrb[18].mxu0 %v1362_v49 }
 0x2e8   :  { %4124 = vmatpush3.bf16.msra.mxu0 %v5025_v34  ;;  %3771 = vmatprep.mubr.f32.mxu0 %v1333_v39 }
 0x2e9   :  { %4126 = vmatprep.subr.bf16.mxu0 %v4125_v10 }
 0x2eb   :  { %3772 = vmatmul.mubr.f32.vlgmr.msra.gmra.mrb[16].mxu0 %v1343_v47 }
 0x2ec   :  { %3774 = vmatprep.mubr.f32.mxu0 %v1353_v58  ;;  %4128 = vmatpush3.bf16.msra.mxu0 %v4125_v10 }
 0x2ed   :  { %4130 = vmatprep.subr.bf16.mxu0 %v5031_v3 }
 0x2ef   :  { %3775 = vmatmul.mubr.f32.gmra.mrb[18].mxu0 %v1363_v54  ;;  %v2007_v54 = vld [vmem:[%s5227_s3] sm:$0xff] }
 0x2f0   :  { %4132 = vmatpush3.bf16.msra.mxu0 %v5031_v3  ;;  %3785 = vmatprep.mubr.f32.mxu0 %v1331_v30 }
 0x2f1   :  { %4134 = vmatprep.subr.bf16.mxu0 %v4796_v31  ;;  %3829 = vmatprep.mubr.msk.f32.mxu1 %vm2035_vm5, %v2007_v54 }
 0x2f3   :  { %3786 = vmatmul.mubr.f32.vlgmr.msra.gmra.mrb[16].mxu0 %v5034_v14 }
 0x2f4   :  { %3788 = vmatprep.mubr.f32.mxu0 %v1351_v35  ;;  %4136 = vmatpush3.bf16.msra.mxu0 %v4796_v31 }
 0x2f5   :  { %4138 = vmatprep.subr.bf16.mxu0 %v5025_v34 }
 0x2f7   :  { %3789 = vmatmul.mubr.f32.gmra.mrb[18].mxu0 %v1361_v48 }
 0x2f8   :  { %4140 = vmatpush3.bf16.msra.mxu0 %v5025_v34  ;;  %3799 = vmatprep.mubr.f32.mxu0 %v1331_v30 }
 0x2fb   :  { %3800 = vmatmul.mubr.f32.vlgmr.msra.gmra.mrb[16].mxu0 %v5034_v14 }
 0x2fc   :  { %3802 = vmatprep.mubr.f32.mxu0 %v1351_v35 }
 0x2ff   :  { %3803 = vmatmul.mubr.f32.gmra.mrb[18].mxu0 %v1361_v48 }
 0x3b6   :  { %v3731_v33 = vpop.f32.mrb[8].mxu1 }
 0x3b7   :  { %v1337_v36 = vpop.f32.mrb[9].mxu1 }
 0x3ba   :  { %v3734_v26 = vpop.f32.mrb[10].mxu1 }
 0x3bb   :  { %v1357_v24 = vpop.f32.mrb[11].mxu1 }
 0x3ce   :  { %v3801_v12 = vpop.f32.mrb[16].mxu0 }
 0x3cf   :  { %v4237_v19 = vadd.f32 %v3801_v12, %v3731_v33  ;;  %v1854_v20 = vpop.f32.mrb[17].mxu0 }
 0x3d0   :  { %v4238_v21 = vadd.f32 %v1854_v20, %v1337_v36 }
 0x3d2   :  { %v4421_v5 = vpack.i.bf16 %v4237_v19, %v4238_v21  ;;  %v3804_v31 = vpop.f32.mrb[18].mxu0 }
 0x3d3   :  { %v4239_v60 = vadd.f32 %v3804_v31, %v3734_v26  ;;  %v1866_v61 = vpop.f32.mrb[19].mxu0 }
 0x3d4   :  { %v4240_v62 = vadd.f32 %v1866_v61, %v1357_v24  ;;  %4422 = vrot.lane.b32.xlu1 %v4421_v5, %s4497_s6 }
 0x3d6   :  { %v4426_v37 = vpack.i.bf16 %v4239_v60, %v4240_v62 }
 0x3d8   :  { %4427 = vrot.lane.b32.xlu0 %v4426_v37, %s4497_s6 }
 0x446   :  { %v4423_v34 = vpop.permute.xlu1 %4422 }
 0x447   :  { %v4425_v38 = vunpack.i.h.bf16 %v4423_v34  ;;  %v4424_v59 = vunpack.i.l.bf16 %v4423_v34 }
 0x449   :  { %v1893_v1 = vmax.f32 %v4237_v19, %v4425_v38  ;;  %v1892_v16 = vmax.f32 %v4238_v21, %v4424_v59 }
 0x44a   :  { %v4428_v17 = vpop.permute.xlu0 %4427 }
 0x44b   :  { %v4430_v18 = vunpack.i.h.bf16 %v4428_v17  ;;  %v4429_v40 = vunpack.i.l.bf16 %v4428_v17  ;;  %v4431_v44 = vpack.i.bf16 %v1893_v1, %v1892_v16  ;;  %v5057_v28 = vpack.c.bf16 %v1893_v1, %v1892_v16 }
 0x44d   :  { %v1895_v23 = vmax.f32 %v4239_v60, %v4430_v18  ;;  %v1894_v27 = vmax.f32 %v4240_v62, %v4429_v40  ;;  %4432 = vrot.lane.b32.xlu1 %v4431_v44, %s4498_s14 }
 0x44f   :  { %v4436_v3 = vpack.i.bf16 %v1895_v23, %v1894_v27  ;;  %v5059_v50 = vpack.c.bf16 %v1895_v23, %v1894_v27 }
 0x451   :  { %4442 = vrot.lane.b32.xlu1 %v4431_v44, %s4499_s1  ;;  %4437 = vrot.lane.b32.xlu0 %v4436_v3, %s4498_s14 }
 0x455   :  { %4452 = vrot.lane.b32.xlu1 %v4431_v44, %s4500_s15  ;;  %4447 = vrot.lane.b32.xlu0 %v4436_v3, %s4499_s1 }
 0x459   :  { %4457 = vrot.lane.b32.xlu1 %v4436_v3, %s4500_s15 }
 0x45d   :  { %4472 = vrot.lane.b32.xlu1 %v4431_v44, %s4494_s27 }
 0x461   :  { %4482 = vrot.lane.b32.xlu1 %v4436_v3, %s4494_s27  ;;  %s4501_s27 = smov 8  }
 0x465   :  { %2017 = vperm.xlu1 %4420, %v2011_v53  }
 0x469   :  { %2027 = vperm.xlu1 %4420, %v2013_v55  }
 0x4bf   :  { %v4433_v2 = vpop.permute.xlu1 %4432 }
 0x4c0   :  { %v4435_v4 = vunpack.i.h.bf16 %v4433_v2  ;;  %v4434_v6 = vunpack.i.l.bf16 %v4433_v2 }
 0x4c2   :  { %v1930_v7 = vsel %vm1912_vm3, 0.0, %v4435_v4  ;;  %v1929_v11 = vsel %vm1912_vm3, 0.0, %v4434_v6 }
 0x4c3   :  { %v4443_v13 = vpop.permute.xlu1 %4442  ;;  %v4438_v14 = vpop.permute.xlu0 %4437  ;;  %v4461_v15 = vpack.i.bf16 %v1930_v7, %v1929_v11 }
 0x4c4   :  { %v4445_v22 = vunpack.i.h.bf16 %v4443_v13  ;;  %v4444_v30 = vunpack.i.l.bf16 %v4443_v13  ;;  %v4440_v41 = vunpack.i.h.bf16 %v4438_v14  ;;  %v4439_v42 = vunpack.i.l.bf16 %v4438_v14 }
 0x4c5   :  { %4462 = vrot.lane.b32.xlu0 %v4461_v15, %s4501_s27 }
 0x4c6   :  { %v1932_v43 = vsel %vm1912_vm3, 0.0, %v4440_v41  ;;  %v1931_v25 = vsel %vm1912_vm3, 0.0, %v4439_v42  ;;  %v1984_v47 = vsel %vm1966_vm4, %v4445_v22, 0.0  ;;  %v1983_v48 = vsel %vm1966_vm4, %v4444_v30, 0.0  ;;  %v2009_v30 = vld [vmem:[%s5227_s3 + $0x10] sm:$0xff]  ;;  %v2137_v41 = vld [vmem:[%s5228_s7] sm:$0xff] }
 0x4c7   :  { %v4448_v45 = vpop.permute.xlu0 %4447  ;;  %v4466_v46 = vpack.i.bf16 %v1932_v43, %v1931_v25  ;;  %v4476_v39 = vpack.i.bf16 %v1984_v47, %v1983_v48  ;;  %v4453_v58 = vpop.permute.xlu1 %4452  ;;  %v2142_v42 = vsel %vm1249_vm2, %v2137_v41, 0  ;;  %v2138_v48 = vld [vmem:[%s5228_s7 + $0x8] sm:$0xff] }
 0x4c8   :  { %v4450_v32 = vunpack.i.h.bf16 %v4448_v45  ;;  %v4449_v35 = vunpack.i.l.bf16 %v4448_v45  ;;  %v4455_v56 = vunpack.i.h.bf16 %v4453_v58  ;;  %v4454_v63 = vunpack.i.l.bf16 %v4453_v58 }
 0x4c9   :  { %4467 = vrot.lane.b32.xlu0 %v4466_v46, %s4501_s27  ;;  %v5123_v43 = vand.u32 4294901760, %v2142_v42 }
 0x4ca   :  { %v1986_v29 = vsel %vm1966_vm4, %v4450_v32, 0.0  ;;  %v1985_v49 = vsel %vm1966_vm4, %v4449_v35, 0.0  ;;  %v1914_v33 = vsel %vm1912_vm3, 0.0, %v4455_v56  ;;  %v1913_v36 = vsel %vm1912_vm3, 0.0, %v4454_v63  ;;  %v2139_v32 = vld [vmem:[%s5228_s7 + $0x10] sm:$0xff] }
 0x4cb   :  { %v4486_v51 = vpack.i.bf16 %v1986_v29, %v1985_v49  ;;  %v4458_v0 = vpop.permute.xlu1 %4457  ;;  %v5126_v25 = vsub.f32 %v2142_v42, %v5123_v43  ;;  %v2145_v35 = vsel %vm1249_vm2, %v2138_v48, 0  ;;  %v2140_v29 = vld [vmem:[%s5228_s7 + $0x18] sm:$0xff] }
 0x4cc   :  { %v4460_v26 = vunpack.i.h.bf16 %v4458_v0  ;;  %v4459_v24 = vunpack.i.l.bf16 %v4458_v0  ;;  %v5143_v49 = vand.u32 4294901760, %v2145_v35 }
 0x4cd   :  { %4477 = vrot.lane.b32.xlu0 %v4476_v39, %s4501_s27  ;;  %v2224_v45 = vand.u32 4294901760, %v5126_v25  ;;  %v2148_v39 = vsel %vm1249_vm2, %v2139_v32, 0 }
 0x4ce   :  { %v1916_v61 = vsel %vm1912_vm3, 0.0, %v4460_v26  ;;  %v1915_v62 = vsel %vm1912_vm3, 0.0, %v4459_v24  ;;  %v5145_v54 = vand.u32 4294901760, %v2148_v39  ;;  %v5149_v0 = vsub.f32 %v2145_v35, %v5143_v49 }
 0x4cf   :  { %v4473_v5 = vpop.permute.xlu1 %4472  ;;  %v2225_v46 = vsub.f32 %v5126_v25, %v2224_v45 }
 0x4d0   :  { %v4475_v1 = vunpack.i.h.bf16 %v4473_v5  ;;  %v4474_v16 = vunpack.i.l.bf16 %v4473_v5  ;;  %v2234_v5 = vand.u32 4294901760, %v5149_v0 }
 0x4d1   :  { %4487 = vrot.lane.b32.xlu0 %v4486_v51, %s4501_s27  ;;  %v2226_v47 = vand.u32 4294901760, %v2225_v46 }
 0x4d2   :  { %v1968_v23 = vsel %vm1966_vm4, %v4475_v1, 0.0  ;;  %v1967_v27 = vsel %vm1966_vm4, %v4474_v16, 0.0 }
 0x4d3   :  { %v4483_v17 = vpop.permute.xlu1 %4482  ;;  %3843 = vmatprep.mubr.f32.mxu0 %v2226_v47 }
 0x4d4   :  { %v4485_v3 = vunpack.i.h.bf16 %v4483_v17  ;;  %v4484_v53 = vunpack.i.l.bf16 %v4483_v17 }
 0x4d5   :  { %2022 = vperm.xlu0 %4419, %v2012_v52  }
 0x4d6   :  { %v1970_v7 = vsel %vm1966_vm4, %v4485_v3, 0.0  ;;  %v1969_v11 = vsel %vm1966_vm4, %v4484_v53, 0.0 }
 0x4d9   :  { %2032 = vperm.xlu0 %4419, %v2014_v57   ;;  %v2151_v57 = vsel %vm1249_vm2, %v2140_v29, 0 }
 0x4e4   :  { %v2018_v52 = vpop.permute.xlu1 %2017 }
 0x537   :  { %v4463_v8 = vpop.permute.xlu0 %4462 }
 0x538   :  { %v4465_v9 = vunpack.i.h.bf16 %v4463_v8  ;;  %v4464_v10 = vunpack.i.l.bf16 %v4463_v8 }
 0x53a   :  { %v1950_v12 = vsel %vm1949_vm6, %v1913_v36, %v4464_v10  ;;  %v1951_v19 = vsel %vm1949_vm6, %v1914_v33, %v4465_v9  ;;  %v5151_v9 = vand.u32 4294901760, %v2151_v57  ;;  %v5154_v33 = vsub.f32 %v2148_v39, %v5145_v54 }
 0x53b   :  { %v4468_v20 = vpop.permute.xlu0 %4467  ;;  %v4141_v21 = vpack.c.bf16 %v1951_v19, %v1950_v12  ;;  %v2028_v12 = vpop.permute.xlu1 %2027 }
 0x53c   :  { %v4470_v31 = vunpack.i.h.bf16 %v4468_v20  ;;  %v4469_v60 = vunpack.i.l.bf16 %v4468_v20 }
 0x53d   :  { %4142 = vmatprep.subr.bf16.mxu1 %v4141_v21 }
 0x53e   :  { %4144 = vmatpush3.bf16.msra.mxu1 %v4141_v21  ;;  %v1952_v37 = vsel %vm1949_vm6, %v1915_v62, %v4469_v60  ;;  %v1953_v34 = vsel %vm1949_vm6, %v1916_v61, %v4470_v31  ;;  %v5158_v61 = vsub.f32 %v2151_v57, %v5151_v9 }
 0x53f   :  { %v4478_v38 = vpop.permute.xlu0 %4477  ;;  %v4145_v59 = vpack.c.bf16 %v1953_v34, %v1952_v37  ;;  %v2244_v34 = vand.u32 4294901760, %v5154_v33 }
 0x540   :  { %v4480_v18 = vunpack.i.h.bf16 %v4478_v38  ;;  %v4479_v40 = vunpack.i.l.bf16 %v4478_v38 }
 0x541   :  { %4146 = vmatprep.subr.bf16.mxu1 %v4145_v59 }
 0x542   :  { %4148 = vmatpush3.bf16.msra.mxu1 %v4145_v59  ;;  %v2003_v4 = vsel %vm1949_vm6, %v1967_v27, %v4479_v40  ;;  %v2004_v6 = vsel %vm1949_vm6, %v1968_v23, %v4480_v18  ;;  %v2235_v18 = vsub.f32 %v5149_v0, %v2234_v5  ;;  %v2254_v23 = vand.u32 4294901760, %v5158_v61 }
 0x543   :  { %v4488_v44 = vpop.permute.xlu0 %4487  ;;  %4150 = vmatprep.subr.bf16.mxu1 %v5057_v28  ;;  %v4157_v13 = vpack.c.bf16 %v2004_v6, %v2003_v4 }
 0x544   :  { %v4490_v55 = vunpack.i.h.bf16 %v4488_v44  ;;  %v4489_v2 = vunpack.i.l.bf16 %v4488_v44 }
 0x546   :  { %4152 = vmatpush3.bf16.msra.mxu1 %v5057_v28  ;;  %v2005_v14 = vsel %vm1949_vm6, %v1969_v11, %v4489_v2  ;;  %v2006_v15 = vsel %vm1949_vm6, %v1970_v7, %v4490_v55  ;;  %v2008_v28 = vld [vmem:[%s5227_s3 + $0x8] sm:$0xff]  ;;  %v2245_v55 = vsub.f32 %v5154_v33, %v2244_v34 }
 0x547   :  { %4154 = vmatprep.subr.bf16.mxu1 %v5059_v50  ;;  %v4161_v22 = vpack.c.bf16 %v2006_v15, %v2005_v14 }
 0x54a   :  { %4156 = vmatpush3.bf16.msra.mxu1 %v5059_v50  ;;  %v2010_v50 = vld [vmem:[%s5227_s3 + $0x18] sm:$0xff] }
 0x54b   :  { %4158 = vmatprep.subr.bf16.mxu1 %v4157_v13 }
 0x54e   :  { %4160 = vmatpush3.bf16.msra.mxu1 %v4157_v13  ;;  %v2236_v13 = vand.u32 4294901760, %v2235_v18 }
 0x54f   :  { %4162 = vmatprep.subr.bf16.mxu1 %v4161_v22 }
 0x552   :  { %4164 = vmatpush3.bf16.msra.mxu1 %v4161_v22 }
 0x554   :  { %v2023_v51 = vpop.permute.xlu0 %2022 }
 0x555   :  { %3830 = vmatmul.mubr.msk.f32.vlgmr.msra.gmra.mrb[12].mxu1 %vm2035_vm5, %v2008_v28  ;;  %v2255_v28 = vsub.f32 %v5158_v61, %v2254_v23 }
 0x556   :  { %3832 = vmatprep.mubr.msk.f32.mxu1 %vm2035_vm5, %v2009_v30 }
 0x557   :  { %v2256_v32 = vand.u32 4294901760, %v2255_v28 }
 0x558   :  { %v2033_v36 = vpop.permute.xlu0 %2032 }
 0x559   :  { %3833 = vmatmul.mubr.msk.f32.gmra.mrb[14].mxu1 %vm2035_vm5, %v2010_v50  ;;  %v2246_v50 = vand.u32 4294901760, %v2245_v55 }
 0x628   :  { %v3831_v58 = vpop.f32.mrb[12].mxu1 }
 0x629   :  { %v2120_v56 = vadd.f32 %v3831_v58, %v2023_v51  ;;  %v2114_v63 = vpop.f32.mrb[13].mxu1 }
 0x62a   :  { %v2115_v8 = vadd.f32 %v2114_v63, %v2018_v52 }
 0x62b   :  { %v2134_v10 = vmax.f32 %v2120_v56, 0.0 }
 0x62c   :  { %v2133_v26 = vmax.f32 %v2115_v8, 0.0  ;;  %v3834_v24 = vpop.f32.mrb[14].mxu1 }
 0x62d   :  { %v2157_v19 = vand.u32 4294901760, %v2134_v10  ;;  %v2130_v20 = vadd.f32 %v3834_v24, %v2033_v36  ;;  %v2124_v21 = vpop.f32.mrb[15].mxu1 }
 0x62e   :  { %v2154_v31 = vand.u32 4294901760, %v2133_v26  ;;  %v2125_v60 = vadd.f32 %v2124_v21, %v2028_v12 }
 0x62f   :  { %v2271_v62 = vsub.f32 %v2134_v10, %v2157_v19  ;;  %v2136_v37 = vmax.f32 %v2130_v20, 0.0 }
 0x630   :  { %v5161_v38 = vpack.c.bf16 %v2157_v19, %v2154_v31  ;;  %v2264_v59 = vsub.f32 %v2133_v26, %v2154_v31  ;;  %v2135_v1 = vmax.f32 %v2125_v60, 0.0 }
 0x631   :  { %v2272_v16 = vand.u32 4294901760, %v2271_v62  ;;  %v2163_v17 = vand.u32 4294901760, %v2136_v37 }
 0x632   :  { %v2265_v40 = vand.u32 4294901760, %v2264_v59  ;;  %v2160_v44 = vand.u32 4294901760, %v2135_v1  ;;  %4166 = vmatprep.subr.bf16.mxu0 %v5161_v38  ;;  %v4181_v27 = vpack.c.bf16 %v2271_v62, %v2264_v59 }
 0x633   :  { %v2285_v3 = vsub.f32 %v2136_v37, %v2163_v17  ;;  %4168 = vmatpush3.bf16.msra.mxu0 %v5161_v38  ;;  %v2273_v53 = vsub.f32 %v2271_v62, %v2272_v16 }
 0x634   :  { %v4169_v2 = vpack.c.bf16 %v2163_v17, %v2160_v44  ;;  %v2278_v4 = vsub.f32 %v2135_v1, %v2160_v44  ;;  %v2266_v6 = vsub.f32 %v2264_v59, %v2265_v40  ;;  %v4197_v7 = vpack.c.bf16 %v2272_v16, %v2265_v40 }
 0x635   :  { %v2286_v11 = vand.u32 4294901760, %v2285_v3  ;;  %v2274_v14 = vand.u32 4294901760, %v2273_v53 }
 0x636   :  { %v2279_v15 = vand.u32 4294901760, %v2278_v4  ;;  %4170 = vmatprep.subr.bf16.mxu0 %v4169_v2  ;;  %v2267_v22 = vand.u32 4294901760, %v2266_v6  ;;  %v4185_v30 = vpack.c.bf16 %v2285_v3, %v2278_v4 }
 0x637   :  { %4172 = vmatpush3.bf16.msra.mxu0 %v4169_v2  ;;  %v2287_v41 = vsub.f32 %v2285_v3, %v2286_v11 }
 0x638   :  { %v4173_v42 = vpack.c.bf16 %v2274_v14, %v2267_v22  ;;  %v2280_v46 = vsub.f32 %v2278_v4, %v2279_v15  ;;  %v4201_v47 = vpack.c.bf16 %v2286_v11, %v2279_v15 }
 0x639   :  { %v2288_v48 = vand.u32 4294901760, %v2287_v41 }
 0x63a   :  { %3844 = vmatmul.mubr.f32.vlgmr.msra.gmra.mrb[20].mxu0 %v2236_v13  ;;  %4174 = vmatprep.subr.bf16.mxu0 %v4173_v42  ;;  %v2281_v35 = vand.u32 4294901760, %v2280_v46 }
 0x63b   :  { %4176 = vmatpush3.bf16.msra.mxu0 %v4173_v42  ;;  %3846 = vmatprep.mubr.f32.mxu0 %v2246_v50 }
 0x63c   :  { %v4177_v39 = vpack.c.bf16 %v2288_v48, %v2281_v35 }
 0x63e   :  { %3847 = vmatmul.mubr.f32.gmra.mrb[22].mxu0 %v2256_v32  ;;  %4178 = vmatprep.subr.bf16.mxu0 %v4177_v39 }
 0x63f   :  { %4180 = vmatpush3.bf16.msra.mxu0 %v4177_v39  ;;  %3857 = vmatprep.mubr.f32.mxu0 %v5123_v43 }
 0x640   :  { %4182 = vmatprep.subr.bf16.mxu0 %v4181_v27 }
 0x642   :  { %3858 = vmatmul.mubr.f32.vlgmr.msra.gmra.mrb[20].mxu0 %v5143_v49 }
 0x643   :  { %4184 = vmatpush3.bf16.msra.mxu0 %v4181_v27  ;;  %3860 = vmatprep.mubr.f32.mxu0 %v5145_v54 }
 0x644   :  { %4186 = vmatprep.subr.bf16.mxu0 %v4185_v30 }
 0x646   :  { %3861 = vmatmul.mubr.f32.gmra.mrb[22].mxu0 %v5151_v9 }
 0x647   :  { %4188 = vmatpush3.bf16.msra.mxu0 %v4185_v30  ;;  %3871 = vmatprep.mubr.f32.mxu0 %v5126_v25  ;;  %v2769_v25 = vld [vmem:[%s5229_s8] sm:$0xff] }
 0x648   :  { %4190 = vmatprep.subr.bf16.mxu0 %v5161_v38  ;;  %v2778_v29 = vand.u32 4294901760, %v2769_v25 }
 0x64a   :  { %3872 = vmatmul.mubr.f32.vlgmr.msra.gmra.mrb[20].mxu0 %v5149_v0  ;;  %v2866_v57 = vsub.f32 %v2769_v25, %v2778_v29 }
 0x64b   :  { %4192 = vmatpush3.bf16.msra.mxu0 %v5161_v38  ;;  %3874 = vmatprep.mubr.f32.mxu0 %v5154_v33 }
 0x64c   :  { %4194 = vmatprep.subr.bf16.mxu0 %v4169_v2 }
 0x64e   :  { %3875 = vmatmul.mubr.f32.gmra.mrb[22].mxu0 %v5158_v61 }
 0x64f   :  { %4196 = vmatpush3.bf16.msra.mxu0 %v4169_v2  ;;  %3885 = vmatprep.mubr.f32.mxu0 %v2224_v45  ;;  %v2770_v45 = vld [vmem:[%s5229_s8 + $0x8] sm:$0xff]  ;;  %s4502_s8 = smov 120  }
 0x650   :  { %4198 = vmatprep.subr.bf16.mxu0 %v4197_v7  ;;  %v2781_v51 = vand.u32 4294901760, %v2770_v45 }
 0x652   :  { %3886 = vmatmul.mubr.f32.vlgmr.msra.gmra.mrb[20].mxu0 %v2234_v5  ;;  %v4213_v52 = vpack.c.bf16 %v2781_v51, %v2778_v29  ;;  %v2873_v58 = vsub.f32 %v2770_v45, %v2781_v51 }
 0x653   :  { %4200 = vmatpush3.bf16.msra.mxu0 %v4197_v7  ;;  %3888 = vmatprep.mubr.f32.mxu0 %v2244_v34 }
 0x654   :  { %4202 = vmatprep.subr.bf16.mxu0 %v4201_v47  ;;  %4214 = vmatprep.subr.bf16.mxu1 %v4213_v52 }
 0x655   :  { %4216 = vmatpush3.bf16.msra.mxu1 %v4213_v52 }
 0x656   :  { %3889 = vmatmul.mubr.f32.gmra.mrb[22].mxu0 %v2254_v23 }
 0x657   :  { %4204 = vmatpush3.bf16.msra.mxu0 %v4201_v47  ;;  %3899 = vmatprep.mubr.f32.mxu0 %v5123_v43 }
 0x658   :  { %4206 = vmatprep.subr.bf16.mxu0 %v5161_v38 }
 0x65a   :  { %3900 = vmatmul.mubr.f32.vlgmr.msra.gmra.mrb[20].mxu0 %v5143_v49 }
 0x65b   :  { %4208 = vmatpush3.bf16.msra.mxu0 %v5161_v38  ;;  %3902 = vmatprep.mubr.f32.mxu0 %v5145_v54 }
 0x65c   :  { %4210 = vmatprep.subr.bf16.mxu0 %v4169_v2 }
 0x65e   :  { %3903 = vmatmul.mubr.f32.gmra.mrb[22].mxu0 %v5151_v9 }
 0x65f   :  { %4212 = vmatpush3.bf16.msra.mxu0 %v4169_v2  ;;  %3913 = vmatprep.mubr.f32.mxu0 %v5123_v43  ;;  %v2867_v43 = vand.u32 4294901760, %v2866_v57 }
 0x662   :  { %3914 = vmatmul.mubr.f32.vlgmr.msra.gmra.mrb[20].mxu0 %v5143_v49  ;;  %v2874_v49 = vand.u32 4294901760, %v2873_v58 }
 0x663   :  { %3916 = vmatprep.mubr.f32.mxu0 %v5145_v54  ;;  %v2868_v54 = vsub.f32 %v2866_v57, %v2867_v43 }
 0x664   :  { %v2875_v56 = vsub.f32 %v2873_v58, %v2874_v49  ;;  %v4229_v10 = vpack.c.bf16 %v2874_v49, %v2867_v43 }
 0x665   :  { %v2869_v63 = vand.u32 4294901760, %v2868_v54 }
 0x666   :  { %3917 = vmatmul.mubr.f32.gmra.mrb[22].mxu0 %v5151_v9  ;;  %v2876_v0 = vand.u32 4294901760, %v2875_v56  ;;  %v4221_v9 = vpack.c.bf16 %v2873_v58, %v2866_v57 }
 0x668   :  { %v4217_v8 = vpack.c.bf16 %v2876_v0, %v2869_v63 }
 0x66a   :  { %4218 = vmatprep.subr.bf16.mxu1 %v4217_v8 }
 0x735   :  { %v3915_v33 = vpop.f32.mrb[20].mxu0 }
 0x736   :  { %v2745_v36 = vpop.f32.mrb[21].mxu0 }
 0x739   :  { %v3918_v26 = vpop.f32.mrb[22].mxu0 }
 0x73a   :  { %v2768_v24 = vmax.f32 %v3915_v33, %v3918_v26  ;;  %v2757_v12 = vpop.f32.mrb[23].mxu0 }
 0x73b   :  { %v2767_v19 = vmax.f32 %v2745_v36, %v2757_v12 }
 0x73c   :  { %v2775_v20 = vsel %vm72_vm1, %v2768_v24, 0 }
 0x73d   :  { %v2854_v21 = vand.u32 4294901760, %v2775_v20  ;;  %v2772_v5 = vsel %vm72_vm1, %v2767_v19, 0 }
 0x73e   :  { %v2844_v31 = vand.u32 4294901760, %v2772_v5 }
 0x73f   :  { %v2855_v60 = vsub.f32 %v2775_v20, %v2854_v21 }
 0x740   :  { %v2845_v61 = vsub.f32 %v2772_v5, %v2844_v31 }
 0x741   :  { %v2856_v62 = vand.u32 4294901760, %v2855_v60 }
 0x742   :  { %v2846_v37 = vand.u32 4294901760, %v2845_v61 }
 0x743   :  { %v2857_v34 = vsub.f32 %v2855_v60, %v2856_v62 }
 0x744   :  { %v2847_v38 = vsub.f32 %v2845_v61, %v2846_v37 }
 0x745   :  { %v2858_v1 = vand.u32 4294901760, %v2857_v34 }
 0x746   :  { %v2848_v59 = vand.u32 4294901760, %v2847_v38 }
 0x748   :  { %3923 = vmatprep.mubr.f32.mxu1 %v2848_v59 }
 0x749   :  { %3924 = vmatmul.mubr.f32.vlgmr.msra.gmra.mrb[16].mxu1 %v2858_v1 }
 0x74a   :  { %4220 = vmatpush3.bf16.msra.mxu1 %v4217_v8  ;;  %3930 = vmatprep.mubr.f32.mxu1 %v2844_v31 }
 0x74b   :  { %4222 = vmatprep.subr.bf16.mxu1 %v4221_v9 }
 0x751   :  { %3931 = vmatmul.mubr.f32.vlgmr.msra.gmra.mrb[16].mxu1 %v2854_v21 }
 0x752   :  { %4224 = vmatpush3.bf16.msra.mxu1 %v4221_v9  ;;  %3937 = vmatprep.mubr.f32.mxu1 %v2845_v61 }
 0x753   :  { %4226 = vmatprep.subr.bf16.mxu1 %v4213_v52 }
 0x759   :  { %3938 = vmatmul.mubr.f32.vlgmr.msra.gmra.mrb[16].mxu1 %v2855_v60 }
 0x75a   :  { %4228 = vmatpush3.bf16.msra.mxu1 %v4213_v52  ;;  %3944 = vmatprep.mubr.f32.mxu1 %v2846_v37 }
 0x75b   :  { %4230 = vmatprep.subr.bf16.mxu1 %v4229_v10 }
 0x761   :  { %3945 = vmatmul.mubr.f32.vlgmr.msra.gmra.mrb[16].mxu1 %v2856_v62 }
 0x762   :  { %4232 = vmatpush3.bf16.msra.mxu1 %v4229_v10  ;;  %3951 = vmatprep.mubr.f32.mxu1 %v2844_v31 }
 0x763   :  { %4234 = vmatprep.subr.bf16.mxu1 %v4213_v52 }
 0x769   :  { %3952 = vmatmul.mubr.f32.vlgmr.msra.gmra.mrb[16].mxu1 %v2854_v21 }
 0x76a   :  { %4236 = vmatpush3.bf16.msra.mxu1 %v4213_v52  ;;  %3958 = vmatprep.mubr.f32.mxu1 %v2844_v31 }
 0x771   :  { %3959 = vmatmul.mubr.f32.vlgmr.msra.gmra.mrb[16].mxu1 %v2854_v21 }
 0x844   :  { %v3960_v16 = vpop.f32.mrb[16].mxu1 }
 0x845   :  { %3283 = vrot.lane.b32.xlu0 %v3960_v16, %s4502_s8  ;;  %v3269_v17 = vpop.f32.mrb[17].mxu1 }
 0x846   :  { %3281 = vrot.lane.b32.xlu1 %v3269_v17, %s4502_s8 }
 0x8b7   :  { %v3284_v18 = vpop.permute.xlu0 %3283 }
 0x8b8   :  { %v3288_v40 = vmax.f32 %v3960_v16, %v3284_v18  ;;  %v3282_v44 = vpop.permute.xlu1 %3281 }
 0x8b9   :  { %v3287_v23 = vmax.f32 %v3269_v17, %v3282_v44 }
 0x8ba   :  { %3291 = vst.msk [vmem:[%s5230_s9 + $0x8] sm:$0xff] %vm3289_vm7, %v3288_v40  ;;  %3296 = vrot.lane.b32.xlu0 %v3288_v40, %s4495_s0 }
 0x8bb   :  { %3290 = vst.msk [vmem:[%s5230_s9] sm:$0xff] %vm3289_vm7, %v3287_v23  ;;  %3294 = vrot.lane.b32.xlu1 %v3287_v23, %s4495_s0 }
 0x92c   :  { %v3297_v27 = vpop.permute.xlu0 %3296 }
 0x92d   :  { %3320 = vst.msk [vmem:[%s5230_s9 + $0x18] sm:$0xff] %vm3289_vm7, %v3297_v27  ;;  %v3295_v3 = vpop.permute.xlu1 %3294 }
 0x92e   :  { %3319 = vst.msk [vmem:[%s5230_s9 + $0x10] sm:$0xff] %vm3289_vm7, %v3295_v3 }

</bundles_post_ra>
